<compile_context>
chip_gen: v7x
topology: tpu7x:2x2x1
jax: 0.10.0
libtpu: 0.0.40
codegen_flags: <defaults>
</compile_context>

<pallas_src>
import functools

import jax
import jax.numpy as jnp
from jax import lax
from jax.experimental import pallas as pl
from jax.experimental.pallas import tpu as pltpu

# ----- configuration matching the module's __init__ hyper-parameters -----
CSMS6S_MODE = "NORMAL"
TOP_K = 2          # number of eigenvectors returned (columns 1 .. TOP_K)
ALPHA = 1.0        # weights == 'old'  ->  A = exp(-alpha * d^2)
WEIGHTS = "old"
TOPK_MODE = "no"   # dense adjacency (no knn sparsification)
# TODO(synk): the topk=='yes' branch (knn scatter into a sparse adjacency) and
# the weights=='new' sigma-scaled variant are not implemented (dense 'old' path only).

_ROW_TILE_TARGET = 256     # sublane (t_i) tile edge for pass-2 output rows


# --------------------------- tiling / budget helpers --------------------------
def _vmem_budget_bytes():
    """Per-step working-set budget, derived from physical VMEM when queryable."""
    try:
        info = pltpu.get_tpu_info()
        cap = getattr(info, "vmem_capacity_bytes", None)
        if cap:
            # ~1/3 of physical, capped: v5e/v6e (128 MiB) -> 40 MiB,
            # v7x (64 MiB) -> ~21 MiB, matching the per-generation guidance.
            return int(min(cap // 3, 40 * 1024 * 1024))
    except Exception:
        pass
    return 20 * 1024 * 1024    # safe default on every generation incl. v7x


def _pick_row_tile(n, target=_ROW_TILE_TARGET):
    """Largest multiple of 128 that divides n and is <= target (None if none)."""
    t = min(target, n)
    t -= t % 128
    while t >= 128:
        if n % t == 0:
            return t
        t -= 128
    return None


def _pass1_bytes(d, tr, tc, in_item):
    """Rough per-step VMEM estimate for the degree pass."""
    return (2 * d * tr * in_item + 2 * d * tc * in_item   # double-buffered feats
            + 3 * tr * tc * 4                             # gram / d2 / adj temps
            + 3 * tc * 4                                  # acc scratch + out
            + 2 * (tr + tc) * 4)                          # sq vectors


def _pass2_bytes(d, ti, tj, in_item):
    """Rough per-step VMEM estimate for the Laplacian pass."""
    return (2 * ti * tj * 4                               # double-buffered f32 out tile
            + 2 * d * ti * in_item + 2 * d * tj * in_item  # double-buffered feats
            + 3 * ti * tj * 4                             # gram / d2 / adj temps
            + 4 * (ti + tj) * 4)                          # sq / dinv vectors


def _pick_col_tile(n, ti, d, in_item, budget, est_fn):
    """Widest lane tile t_j = k*ti dividing n whose VMEM estimate fits budget."""
    best = ti
    k = 2
    while k * ti <= n:
        tj = k * ti
        if n % tj == 0 and est_fn(d, ti, tj, in_item) <= budget:
            best = tj
        k += 1
    return best


def _vmem_limit(est_bytes):
    # explicit limit >= working set with headroom; always above v5e's 16 MiB default
    return max(int(est_bytes * 1.25) + (8 << 20), 32 << 20)


# --------------------------- pass 1: degrees ---------------------------------
def _degree_kernel(xr_ref, xc_ref, sqr_ref, sqc_ref, dinv_ref, acc_ref, *, alpha):
    """Accumulate degree(c) = sum_r exp(-alpha * d2(r, c)) over row blocks.

    xr_ref:  (D, t_r)  features of the reduction-row nodes (bf16, channel-major)
    xc_ref:  (D, t_c)  features of the output-column nodes (held across r)
    sqr_ref: (t_r, 1)  f32 squared norms of reduction-row nodes (column layout)
    sqc_ref: (1, t_c)  f32 squared norms of output-column nodes (row layout)
    dinv_ref:(1, t_c)  lane-dense D^{-1/2} output block
    acc_ref: (1, t_c)  VMEM accumulator (persists across the reduction axis)
    """
    r = pl.program_id(2)

    @pl.when(r == 0)
    def _():
        acc_ref[...] = jnp.zeros_like(acc_ref)

    # Gram between row-block and column-block nodes, contracting the channel
    # dim (axis 0 of both): (t_r, t_c) on the MXU, f32 accumulation.
    gram = lax.dot_general(xr_ref[...], xc_ref[...], (((0,), (0,)), ((), ())),
                           preferred_element_type=jnp.float32)
    d2 = jnp.maximum(sqr_ref[...] + sqc_ref[...] - 2.0 * gram, 0.0)
    adj = jnp.exp(-d2) if alpha == 1.0 else jnp.exp(-alpha * d2)
    acc_ref[...] += jnp.sum(adj, axis=0, keepdims=True)        # (1, t_c) lane-dense

    @pl.when(r == pl.num_programs(2) - 1)
    def _():
        dinv_ref[...] = lax.rsqrt(acc_ref[...])                # degree ** -0.5


# --------------------------- pass 2: Laplacian tiles --------------------------
def _laplacian_kernel(xi_ref, xj_ref, sqi_ref, sqj_ref, dii_ref, djj_ref, l_ref,
                      *, ti, tj, alpha):
    """One lane-wide (t_i, t_j) tile of L = I - D^{-1/2} A D^{-1/2}."""
    jb = pl.program_id(1)
    ib = pl.program_id(2)

    gram = lax.dot_general(xi_ref[...], xj_ref[...], (((0,), (0,)), ((), ())),
                           preferred_element_type=jnp.float32)          # (t_i, t_j)
    d2 = jnp.maximum(sqi_ref[...] + sqj_ref[...] - 2.0 * gram, 0.0)
    adj = jnp.exp(-d2) if alpha == 1.0 else jnp.exp(-alpha * d2)
    neg = -(dii_ref[...] * adj * djj_ref[...])                  # -(D^-1/2 A D^-1/2)
    l_ref[...] = neg

    # Only tiles that intersect the global diagonal carry the identity; all
    # other tiles skip the iota/compare work entirely.  t_j is a multiple of
    # t_i, so the row range of tile (ib, jb) hits the diagonal iff
    # ib // (t_j // t_i) == jb.
    ratio = tj // ti

    @pl.when(ib // ratio == jb)
    def _():
        off = ib * ti - jb * tj                      # local column offset of the diagonal
        rows = lax.broadcasted_iota(jnp.int32, (ti, tj), 0)
        cols = lax.broadcasted_iota(jnp.int32, (ti, tj), 1)
        l_ref[...] = jnp.where(cols == rows + off, 1.0 + neg, neg)


def symmetric_laplacian_pallas(feats_bdn, *, alpha=ALPHA, matmul_dtype=jnp.bfloat16,
                               row_tile=None, col_tile=None, vmem_budget=None):
    """feats_bdn: (B, D, N) channel-major -> (B, N, N) symmetric normalized Laplacian."""
    B, D, N = feats_bdn.shape
    ti = row_tile if row_tile is not None else _pick_row_tile(N)
    assert ti is not None and N % ti == 0, "N must be a multiple of 128 for the Pallas path"

    in_item = jnp.dtype(matmul_dtype).itemsize
    budget = vmem_budget if vmem_budget is not None else _vmem_budget_bytes()
    t1c = col_tile if col_tile is not None else _pick_col_tile(N, ti, D, in_item, budget, _pass1_bytes)
    t2j = col_tile if col_tile is not None else _pick_col_tile(N, ti, D, in_item, budget, _pass2_bytes)
    assert t1c % ti == 0 and N % t1c == 0
    assert t2j % ti == 0 and N % t2j == 0

    xf = feats_bdn.astype(jnp.float32)
    xb = feats_bdn.astype(matmul_dtype)                  # bf16 MXU feed (half the input bytes)
    # Squared node norms in f32 (exact), in both row (lane-dense) and column
    # layouts so no in-kernel transposes are needed.
    sq_row = jnp.sum(xf * xf, axis=1, keepdims=True)     # (B, 1, N)
    sq_col = jnp.swapaxes(sq_row, 1, 2)                  # (B, N, 1)

    # ---- pass 1: D^{-1/2}, lane-dense (B, 1, N), reduction axis last --------
    nb_r = N // ti
    nb_c = N // t1c
    dinv_row = pl.pallas_call(
        functools.partial(_degree_kernel, alpha=alpha),
        out_shape=jax.ShapeDtypeStruct((B, 1, N), jnp.float32),
        grid=(B, nb_c, nb_r),
        in_specs=[
            pl.BlockSpec((None, D, ti),  lambda b, c, r: (b, 0, r)),   # row-block feats
            pl.BlockSpec((None, D, t1c), lambda b, c, r: (b, 0, c)),   # col-block feats (held over r)
            pl.BlockSpec((None, ti, 1),  lambda b, c, r: (b, r, 0)),   # |x_r|^2 column
            pl.BlockSpec((None, 1, t1c), lambda b, c, r: (b, 0, c)),   # |x_c|^2 row
        ],
        out_specs=pl.BlockSpec((None, 1, t1c), lambda b, c, r: (b, 0, c)),
        scratch_shapes=[pltpu.VMEM((1, t1c), jnp.float32)],
        compiler_params=pltpu.CompilerParams(
            dimension_semantics=("parallel", "parallel", "arbitrary"),
            vmem_limit_bytes=_vmem_limit(_pass1_bytes(D, ti, t1c, in_item))),
        cost_estimate=pl.CostEstimate(
            flops=2 * B * N * N * D + 5 * B * N * N,
            transcendentals=B * N * N,
            bytes_accessed=in_item * B * D * N * (1 + nb_c) + 4 * B * N),
    )(xb, xb, sq_col, sq_row)
    dinv_col = jnp.swapaxes(dinv_row, 1, 2)              # (B, N, 1) tiny

    # ---- pass 2: tiled L = I - D^{-1/2} A D^{-1/2}, lane-wide output tiles ---
    nb_i = N // ti
    nb_j = N // t2j
    return pl.pallas_call(
        functools.partial(_laplacian_kernel, ti=ti, tj=t2j, alpha=alpha),
        out_shape=jax.ShapeDtypeStruct((B, N, N), jnp.float32),
        # i innermost: the wide x_j block index is constant over the inner loop
        # so it is DMAed once per (b, j), not per step.
        grid=(B, nb_j, nb_i),
        in_specs=[
            pl.BlockSpec((None, D, ti),   lambda b, j, i: (b, 0, i)),  # x_i
            pl.BlockSpec((None, D, t2j),  lambda b, j, i: (b, 0, j)),  # x_j (wide, resident)
            pl.BlockSpec((None, ti, 1),   lambda b, j, i: (b, i, 0)),  # |x_i|^2
            pl.BlockSpec((None, 1, t2j),  lambda b, j, i: (b, 0, j)),  # |x_j|^2
            pl.BlockSpec((None, ti, 1),   lambda b, j, i: (b, i, 0)),  # D^{-1/2}_i
            pl.BlockSpec((None, 1, t2j),  lambda b, j, i: (b, 0, j)),  # D^{-1/2}_j
        ],
        out_specs=pl.BlockSpec((None, ti, t2j), lambda b, j, i: (b, i, j)),
        compiler_params=pltpu.CompilerParams(
            dimension_semantics=("parallel", "parallel", "parallel"),
            vmem_limit_bytes=_vmem_limit(_pass2_bytes(D, ti, t2j, in_item))),
        cost_estimate=pl.CostEstimate(
            flops=2 * B * N * N * D + 6 * B * N * N,
            transcendentals=B * N * N,
            bytes_accessed=4 * B * N * N + in_item * B * D * N * (1 + nb_j) + 12 * B * N),
    )(xb, xb, sq_col, sq_row, dinv_col, dinv_row)


# --------------------------- pure-JAX fallback / reference -------------------
def _symmetric_laplacian_ref(feats_bdn, alpha=ALPHA):
    """(B, D, N) -> (B, N, N), plain XLA (used when N is not tileable / tiny)."""
    x = jnp.swapaxes(feats_bdn, 1, 2).astype(jnp.float32)        # (B, N, D)
    gram = jnp.einsum("bnd,bmd->bnm", x, x, precision=lax.Precision.HIGHEST)
    sq = jnp.sum(x * x, axis=-1)
    d2 = jnp.maximum(sq[:, :, None] + sq[:, None, :] - 2.0 * gram, 0.0)
    adj = jnp.exp(-alpha * d2)
    dinv = lax.rsqrt(jnp.sum(adj, axis=-1))
    norm_adj = dinv[:, :, None] * adj * dinv[:, None, :]
    eye = jnp.eye(x.shape[1], dtype=jnp.float32)[None]
    return eye - norm_adj


# --------------------------- eigen post-processing (JAX) ----------------------
def topk_eigenvectors(eigenvalues, eigenvectors, top_k):
    """Mirror of CrossScan.topk_eigenvectors (sort, slice 1..k, sign fix, re-sort)."""
    idx = jnp.argsort(eigenvalues, axis=1)                                  # (B, N)
    sorted_vecs = jnp.take_along_axis(eigenvectors, idx[:, None, :], axis=2)
    smallest = sorted_vecs[:, :, 1:top_k + 1]                               # (B, N, k)

    mean_vals = jnp.mean(smallest, axis=2)                                  # (B, N)
    signs = jnp.sign(mean_vals)[:, :, None]                                 # (B, N, 1)
    smallest = smallest * signs

    sorted_smallest = jnp.sort(smallest, axis=1)
    new_indices = jnp.argsort(smallest, axis=1)
    return sorted_smallest, new_indices


def cross_scan_forward(features_nchw, top_k=TOP_K):
    """CrossScan.forward for csms6s_mode='NORMAL' (dense adjacency path)."""
    B, D, H, W = features_nchw.shape
    N = H * W
    feats_bdn = features_nchw.reshape(B, D, N)       # channel-major, no transpose
    if _pick_row_tile(N) is not None:
        l_sym = symmetric_laplacian_pallas(feats_bdn)
    else:
        # e.g. 14x14=196 nodes: not a multiple of 128, plain XLA path.
        l_sym = _symmetric_laplacian_ref(feats_bdn)
    # TODO(synk): torch.linalg.eigh has no Pallas equivalent; use jnp.linalg.eigh.
    eigenvalues, eigenvectors = jnp.linalg.eigh(l_sym)
    return topk_eigenvectors(eigenvalues, eigenvectors, top_k)


if __name__ == "__main__":
    key = jax.random.PRNGKey(0)
    B, D, H, W = 2, 4, 16, 16          # N = H*W = 256 nodes -> Pallas path
    features = jax.random.normal(key, (B, D, H, W), dtype=jnp.float32)

    feats_bdn = features.reshape(B, D, H * W)
    l_ref = jax.block_until_ready(_symmetric_laplacian_ref(feats_bdn))

    # f32 MXU feed: tight check against the plain-XLA reference
    l_f32 = jax.block_until_ready(
        symmetric_laplacian_pallas(feats_bdn, matmul_dtype=jnp.float32))
    assert l_f32.shape == (B, H * W, H * W)
    assert float(jnp.max(jnp.abs(l_f32 - l_ref))) < 3e-2

    # default bf16 MXU feed (perf path): looser tolerance from bf16 Gram rounding
    l_bf16 = jax.block_until_ready(symmetric_laplacian_pallas(feats_bdn))
    assert float(jnp.max(jnp.abs(l_bf16 - l_ref))) < 5e-2

    sorted_vecs, indices = cross_scan_forward(features, top_k=TOP_K)
    jax.block_until_ready((sorted_vecs, indices))

    assert sorted_vecs.shape == (B, H * W, TOP_K)
    assert indices.shape == (B, H * W, TOP_K)
    print("KERNEL_OK")
</pallas_src>

<mosaic_0001>
module attributes {stable_mosaic.version = 11 : i64} {
  func.func @_degree_kernel(%arg0: i32, %arg1: i32, %arg2: i32, %arg3: memref<1x4x256xf32, #tpu.memory_space<vmem>>, %arg4: memref<1x4x256xf32, #tpu.memory_space<vmem>>, %arg5: memref<1x256x1xf32, #tpu.memory_space<vmem>>, %arg6: memref<1x1x256xf32, #tpu.memory_space<vmem>>, %arg7: memref<1x1x256xf32, #tpu.memory_space<vmem>>, %arg8: memref<1x256xf32, #tpu.memory_space<vmem>>) attributes {dimension_semantics = [#tpu.dimension_semantics<parallel>, #tpu.dimension_semantics<parallel>, #tpu.dimension_semantics<arbitrary>], iteration_bounds = array<i64: 2, 1, 1>, scalar_prefetch = 0 : i64, scratch_operands = 1 : i64, tpu.core_type = #tpu.core_type<tc>, window_params = [{transform_indices = @transform_0, window_bounds = array<i64: 1, 4, 256>}, {transform_indices = @transform_1, window_bounds = array<i64: 1, 4, 256>}, {transform_indices = @transform_2, window_bounds = array<i64: 1, 256, 1>}, {transform_indices = @transform_3, window_bounds = array<i64: 1, 1, 256>}, {transform_indices = @transform_4, window_bounds = array<i64: 1, 1, 256>}]} {
    %c0_i32 = arith.constant 0 : i32
    %0 = arith.cmpi eq, %arg2, %c0_i32 : i32
    %1 = arith.extui %0 : i1 to i32
    %c0_i32_0 = arith.constant 0 : i32
    %2 = arith.cmpi ne, %1, %c0_i32_0 : i32
    scf.if %2 {
      %cst_22 = arith.constant 0.000000e+00 : f32
      %31 = vector.broadcast %cst_22 : f32 to vector<1x256xf32>
      %c0_23 = arith.constant 0 : index
      %c0_24 = arith.constant 0 : index
      %32 = vector.load %arg8[%c0_23, %c0_24] : memref<1x256xf32, #tpu.memory_space<vmem>>, vector<1x256xf32>
      tpu.vector_store %arg8[%c0_23, %c0_24], %31 {strides = array<i32>} : memref<1x256xf32, #tpu.memory_space<vmem>>, vector<1x256xf32>,
    } else {
    }
    %c0 = arith.constant 0 : index
    %c0_1 = arith.constant 0 : index
    %c0_2 = arith.constant 0 : index
    %3 = vector.load %arg3[%c0, %c0_1, %c0_2] : memref<1x4x256xf32, #tpu.memory_space<vmem>>, vector<1x4x256xf32>
    %4 = vector.shape_cast %3 : vector<1x4x256xf32> to vector<4x256xf32>
    %c0_3 = arith.constant 0 : index
    %c0_4 = arith.constant 0 : index
    %c0_5 = arith.constant 0 : index
    %5 = vector.load %arg4[%c0_3, %c0_4, %c0_5] : memref<1x4x256xf32, #tpu.memory_space<vmem>>, vector<1x4x256xf32>
    %6 = vector.shape_cast %5 : vector<1x4x256xf32> to vector<4x256xf32>
    %cst = arith.constant dense<0.000000e+00> : vector<256x256xf32>
    %7 = tpu.matmul %4, %6, %cst {dimension_numbers = #tpu.dot_dimension_numbers<[0], [0], [1], [1], [0, 1, 1, 1], [], []>} : vector<4x256xf32>, vector<4x256xf32>, vector<256x256xf32> -> vector<256x256xf32>
    %c0_6 = arith.constant 0 : index
    %c0_7 = arith.constant 0 : index
    %c0_8 = arith.constant 0 : index
    %8 = vector.load %arg5[%c0_6, %c0_7, %c0_8] : memref<1x256x1xf32, #tpu.memory_space<vmem>>, vector<1x256x1xf32>
    %9 = vector.shape_cast %8 : vector<1x256x1xf32> to vector<256x1xf32>
    %c0_9 = arith.constant 0 : index
    %c0_10 = arith.constant 0 : index
    %c0_11 = arith.constant 0 : index
    %10 = vector.load %arg6[%c0_9, %c0_10, %c0_11] : memref<1x1x256xf32, #tpu.memory_space<vmem>>, vector<1x1x256xf32>
    %11 = vector.shape_cast %10 : vector<1x1x256xf32> to vector<1x256xf32>
    %12 = vector.broadcast %9 : vector<256x1xf32> to vector<256x256xf32>
    %13 = vector.broadcast %11 : vector<1x256xf32> to vector<256x256xf32>
    %14 = arith.addf %12, %13 : vector<256x256xf32>
    %cst_12 = arith.constant 2.000000e+00 : f32
    %15 = vector.broadcast %cst_12 : f32 to vector<256x256xf32>
    %16 = arith.mulf %15, %7 : vector<256x256xf32>
    %17 = arith.subf %14, %16 : vector<256x256xf32>
    %cst_13 = arith.constant 0.000000e+00 : f32
    %18 = vector.broadcast %cst_13 : f32 to vector<256x256xf32>
    %19 = arith.maximumf %17, %18 : vector<256x256xf32>
    %cst_14 = arith.constant 0.000000e+00 : f32
    %20 = vector.broadcast %cst_14 : f32 to vector<256x256xf32>
    %21 = arith.subf %20, %19 : vector<256x256xf32>
    %22 = math.exp %21 : vector<256x256xf32>
    %c0_15 = arith.constant 0 : index
    %c0_16 = arith.constant 0 : index
    %23 = vector.load %arg8[%c0_15, %c0_16] : memref<1x256xf32, #tpu.memory_space<vmem>>, vector<1x256xf32>
    %cst_17 = arith.constant dense<0.000000e+00> : vector<256xf32>
    %24 = vector.multi_reduction <add>, %22, %cst_17 [0] : vector<256x256xf32> to vector<256xf32>
    %25 = vector.shape_cast %24 : vector<256xf32> to vector<1x256xf32>
    %26 = arith.addf %23, %25 : vector<1x256xf32>
    %c0_18 = arith.constant 0 : index
    %c0_19 = arith.constant 0 : index
    %27 = vector.load %arg8[%c0_18, %c0_19] : memref<1x256xf32, #tpu.memory_space<vmem>>, vector<1x256xf32>
    tpu.vector_store %arg8[%c0_18, %c0_19], %26 {strides = array<i32>} : memref<1x256xf32, #tpu.memory_space<vmem>>, vector<1x256xf32>,
    %c0_i32_20 = arith.constant 0 : i32
    %28 = arith.cmpi eq, %arg2, %c0_i32_20 : i32
    %29 = arith.extui %28 : i1 to i32
    %c0_i32_21 = arith.constant 0 : i32
    %30 = arith.cmpi ne, %29, %c0_i32_21 : i32
    scf.if %30 {
      %c0_22 = arith.constant 0 : index
      %c0_23 = arith.constant 0 : index
      %31 = vector.load %arg8[%c0_22, %c0_23] : memref<1x256xf32, #tpu.memory_space<vmem>>, vector<1x256xf32>
      %32 = math.rsqrt %31 : vector<1x256xf32>
      %c0_24 = arith.constant 0 : index
      %c0_25 = arith.constant 0 : index
      %c0_26 = arith.constant 0 : index
      %33 = vector.load %arg7[%c0_24, %c0_25, %c0_26] : memref<1x1x256xf32, #tpu.memory_space<vmem>>, vector<1x1x256xf32>
      %34 = vector.shape_cast %33 : vector<1x1x256xf32> to vector<1x256xf32>
      %35 = vector.shape_cast %32 : vector<1x256xf32> to vector<1x1x256xf32>
      tpu.vector_store %arg7[%c0_24, %c0_25, %c0_26], %35 {strides = array<i32>} : memref<1x1x256xf32, #tpu.memory_space<vmem>>, vector<1x1x256xf32>,
    } else {
    }
    return
  }
  func.func @transform_0(%arg0: i32, %arg1: i32, %arg2: i32) -> (i32, i32, i32) {
    %c0_i32 = arith.constant 0 : i32
    %c0_i32_0 = arith.constant 0 : i32
    return %arg0, %c0_i32, %arg2 : i32, i32, i32
  }
  func.func @transform_1(%arg0: i32, %arg1: i32, %arg2: i32) -> (i32, i32, i32) {
    %c0_i32 = arith.constant 0 : i32
    %c0_i32_0 = arith.constant 0 : i32
    return %arg0, %c0_i32, %arg1 : i32, i32, i32
  }
  func.func @transform_2(%arg0: i32, %arg1: i32, %arg2: i32) -> (i32, i32, i32) {
    %c0_i32 = arith.constant 0 : i32
    %c0_i32_0 = arith.constant 0 : i32
    return %arg0, %arg2, %c0_i32 : i32, i32, i32
  }
  func.func @transform_3(%arg0: i32, %arg1: i32, %arg2: i32) -> (i32, i32, i32) {
    %c0_i32 = arith.constant 0 : i32
    %c0_i32_0 = arith.constant 0 : i32
    return %arg0, %c0_i32, %arg1 : i32, i32, i32
  }
  func.func @transform_4(%arg0: i32, %arg1: i32, %arg2: i32) -> (i32, i32, i32) {
    %c0_i32 = arith.constant 0 : i32
    %c0_i32_0 = arith.constant 0 : i32
    return %arg0, %c0_i32, %arg1 : i32, i32, i32
  }
}

</mosaic_0001>

<bundles_post_ra>
// kernel: tpu_custom_call.1
= control target key start
LH: loop header
LB: loop body
LE: loop exit
PB: predicated region body
PF: predicated region fallthrough
CT: control target
= control target key end

     0   :  { %9 = vsyncpa [#allocation4], 0  ;;  %s2441_s0 = inlined_call_operand.vmem [shape: f32[2,4,256], index: 0, kind: input, shape index: {}]   ;;  %s2442_s1 = inlined_call_operand.vmem [shape: f32[2,4,256], index: 1, kind: input, shape index: {}]   ;;  %s2443_s2 = inlined_call_operand.vmem [shape: f32[2,256,1], index: 2, kind: input, shape index: {}]   ;;  %s2444_s3 = inlined_call_operand.vmem [shape: f32[2,1,256], index: 3, kind: input, shape index: {}]   ;;  %s2445_s4 = inlined_call_operand.hbm [shape: f32[2,1,256], index: 4, kind: output, shape index: {}]  }
   0x1   :  { %11 = vsyncpa [#allocation4 + $0x1], 0  ;;  %s2041_s15 = smov 0   ;;  %s2043_s16 = smov 0  }
   0x2   :  { %s2045_s17 = smov 0   ;;  %s2047_s18 = smov 0  }
   0x3   :  { %s2049_s19 = smov 0   ;;  %s2051_s20 = smov 0  }
   0x4 LB: > { %s1682_s21 = sadd.s32 4294967295, %s2010_s20   ;;  %s1683_s22 = sadd.s32 4294967294, %s2010_s20   ;;  %s2010_s20 = sphi %s2051_s20, %s17_s20   ;;  %s2006_s19 = sphi %s2049_s19, %s2454_s19   ;;  %s2002_s18 = sphi %s2047_s18, %s2453_s18   ;;  %s1998_s17 = sphi %s2045_s17, %s2452_s17   ;;  %s1994_s16 = sphi %s2043_s16, %s2451_s16   ;;  %s1990_s15 = sphi %s2041_s15, %s2450_s15  }
   0x5   : > { %s36_s23 = sadd.s32 1, %s2006_s19  ;;  %s157_s24 = sadd.s32 1, %s1998_s17 }
   0x6   : > { %p38_p0 = scmp.ge.s32.totalorder %s36_s23, 2  ;;  %p167_p1 = scmp.ne.s32.totalorder %s1998_s17, %s1994_s16 }
   0x7   : > { %p168_p2 = scmp.eq.s32.totalorder %s1682_s21, 1  ;;  %p173_p3 = scmp.ne.s32.totalorder %s1994_s16, %s1990_s15 }
   0x8   : > { %s2456_s23 = smov (%p38_p0, %s36_s23), 0  ;;  %p174_p5 = scmp.eq.s32.totalorder %s1683_s22, 1 }
   0x9   : > { %p2081_p4 = por %p168_p2, %p167_p1  ;;  %s152_s26 = ssub.s32 %s2006_s19, %s2456_s23 }
   0xa   : > { %p1686_p6 = scmp.ge.s32.totalorder %s2010_s20, 1  ;;  %p155_p7 = scmp.eq.s32.totalorder %s152_s26, 0 }
   0xb   : > { %p2088_p8 = por %p174_p5, %p173_p3  ;;  %p243_p9 = scmp.lt.s32.totalorder %s2010_s20, 3 }
   0xc   : > { %s2094_s28 = scalar_select %p155_p7, %s1998_s17, %s157_s24  }
   0xd   : > { %p244_p10 = pnand %p1686_p6, %p243_p9 }
   0xe   : > { %p300_p11 = scmp.lt.s32.totalorder (!%p244_p10), %s2002_s18, 1  ;;  %v2012_v0 = vmov (!%p244_p10), 0   ;;  %v2013_v1 = vmov (!%p244_p10), 0.0   ;;  %vm516_vm0 = vcmask (!%p244_p10), 1043456   ;;  %vm419_vm1 = vcmask (!%p244_p10), 31744  }
   0xf   : > { %247 = sbr.rel (%p244_p10) target bundleno = 569 (0x239), region = 36  ;;  %1798 = vset.pattern.permute.xlu1 (!%p244_p10), %v2012_v0  ;;  %585 = vmatprep.mubr.f32.mxu0 (!%p244_p10), %v2013_v1 }
  0x10   : > { %681 = vmatprep.mubr.f32.mxu1 (!%p244_p10), %v2013_v1 }
  0x16   : > { %s2100_s29 = scalar_select %p300_p11, %s2002_s18, 1 }
  0x18   : > { %s1734_s30 = sshll.u32 %s2100_s29, 3  ;;  %s1736_s5 = sshll.u32 %s2100_s29, 8 }
  0x19   : > { %s307_s8 = scalar_lea.vmem %s2441_s0, %s1734_s30  ;;  %s317_s11 = scalar_lea.vmem %s2442_s1, %s1734_s30 }
  0x1a   : > { %s2114_s14 = scalar_lea.vmem %s2443_s2, %s1736_s5  ;;  %v348_v2 = vld [vmem:[%s307_s8] sm:$0xff]  ;;  %s1694_s21 = sshll.u32 %s2100_s29, 1 }
  0x1b   : > { %v349_v3 = vld [vmem:[%s317_s11] sm:$0xff]  ;;  %353 = vxpose.xlu0.b32.start.end [1/1] (short) %v348_v2, 128  ;;  %v779_v6 = vld [vmem:[%s2114_s14 + $0x8] sm:$0xff]  ;;  %v780_v7 = vld [vmem:[%s2114_s14 + $0x10] sm:$0xff]  ;;  %v351_v20 = vcombine.high %v348_v2, %v348_v2  ;;  %s336_s26 = scalar_lea.vmem %s2444_s3, %s1694_s21  ;;  %s296_s29 = sand.u32 1, %s1994_s16  }
  0x1c   : > { %v778_v4 = vld [vmem:[%s2114_s14] sm:$0xff]  ;;  %v418_v5 = vcombine.high %v349_v3, %v349_v3  ;;  %v781_v8 = vld [vmem:[%s2114_s14 + $0x18] sm:$0xff]  ;;  %v783_v10 = vld [vmem:[%s2114_s14 + $0x28] sm:$0xff]  ;;  %s1687_s30 = sshll.u32 %s296_s29, 1  ;;  %s1737_s5 = sshll.u32 %s2002_s18, 5 }
  0x1d   : > { %813 = vperm.xlu1 %1798, %v778_v4   ;;  %v782_v9 = vld [vmem:[%s2114_s14 + $0x20] sm:$0xff]  ;;  %v784_v11 = vld [vmem:[%s2114_s14 + $0x30] sm:$0xff]  ;;  %v785_v12 = vld [vmem:[%s2114_s14 + $0x38] sm:$0xff]  ;;  %s298_s6 = scalar_lea.vmem [#allocation3], %s1687_s30  ;;  %s2392_s10 = scalar_lea.hbm %s2445_s4, %s1737_s5 }
  0x1e   : > { %1695 = vmatprep.subr.msk.mxu0 %vm516_vm0, %v418_v5  ;;  %1738 = vmatprep.subr.msk.mxu1 %vm516_vm0, %v418_v5  ;;  %v786_v13 = vld [vmem:[%s2114_s14 + $0x40] sm:$0xff]  ;;  %v787_v14 = vld [vmem:[%s2114_s14 + $0x48] sm:$0xff]  ;;  %v788_v15 = vld [vmem:[%s2114_s14 + $0x50] sm:$0xff]  ;;  %s1552_s7 = sshll.u32 %s298_s6, 4  ;;  %s1536_s11 = scalar_lea.sflag [#allocation4], %s296_s29  ;;  %s2394_s7 = int_to_ptr.vmem [resolvable:$true] %s1552_s7 }
  0x1f   : > { %1696 = vmatpush1.msk.msra.mxu0 %vm516_vm0, %v349_v3  ;;  %1739 = vmatpush1.msk.msra.mxu1 %vm516_vm0, %v349_v3  ;;  %v789_v16 = vld [vmem:[%s2114_s14 + $0x58] sm:$0xff]  ;;  %v790_v17 = vld [vmem:[%s2114_s14 + $0x60] sm:$0xff]  ;;  %v791_v18 = vld [vmem:[%s2114_s14 + $0x68] sm:$0xff]  ;;  %s1932_s12 = scalar_lea.vmem %s2394_s7, 32  ;;  %s2015_s18 = smov [#allocation3]  }
  0x20   : > { %v792_v19 = vld [vmem:[%s2114_s14 + $0x70] sm:$0xff]  ;;  %v793_v21 = vld [vmem:[%s2114_s14 + $0x78] sm:$0xff]  ;;  %v794_v22 = vld [vmem:[%s2114_s14 + $0x80] sm:$0xff]  ;;  %p1933_p12 = scmp.ne.s32.totalorder %s2394_s7, %s1932_s12  ;;  %s1936_s13 = sshll.u32 %s2015_s18, 4  ;;  %s1937_s13 = int_to_ptr.vmem [resolvable:$false] %s1936_s13 }
  0x21   : > { %818 = vperm.xlu1 %1798, %v779_v6   ;;  %v796_v23 = vld [vmem:[%s2114_s14 + $0x90] sm:$0xff]  ;;  %v797_v24 = vld [vmem:[%s2114_s14 + $0x98] sm:$0xff]  ;;  %v798_v25 = vld [vmem:[%s2114_s14 + $0xa0] sm:$0xff]  ;;  %p1939_p1 = scmp.lt.s32.totalorder %s2394_s7, %s1937_s13 }
  0x22   : > { %v799_v26 = vld [vmem:[%s2114_s14 + $0xa8] sm:$0xff]  ;;  %v800_v27 = vld [vmem:[%s2114_s14 + $0xb0] sm:$0xff]  ;;  %v801_v28 = vld [vmem:[%s2114_s14 + $0xb8] sm:$0xff]  ;;  %p1934_p13 = pnand %p1933_p12, %p2081_p4 }
  0x23   : > { %v802_v29 = vld [vmem:[%s2114_s14 + $0xc0] sm:$0xff]  ;;  %v803_v30 = vld [vmem:[%s2114_s14 + $0xc8] sm:$0xff]  ;;  %v804_v31 = vld [vmem:[%s2114_s14 + $0xd0] sm:$0xff] }
  0x24   : > { %v805_v32 = vld [vmem:[%s2114_s14 + $0xd8] sm:$0xff]  ;;  %v806_v33 = vld [vmem:[%s2114_s14 + $0xe0] sm:$0xff]  ;;  %v807_v34 = vld [vmem:[%s2114_s14 + $0xe8] sm:$0xff]  ;;  %p1935_p0 = pneg %p1934_p13 }
  0x25   : > { %823 = vperm.xlu1 %1798, %v780_v7   ;;  %v808_v35 = vld [vmem:[%s2114_s14 + $0xf0] sm:$0xff]  ;;  %v809_v36 = vld [vmem:[%s2114_s14 + $0xf8] sm:$0xff]  ;;  %v795_v45 = vld [vmem:[%s2114_s14 + $0x88] sm:$0xff]  ;;  %s1938_s14 = scalar_lea.vmem %s1937_s13, 64 }
  0x26   : > { %p1940_p2 = scmp.lt.s32.totalorder %s1938_s14, %s1932_s12 }
  0x28   : > { %p1941_p3 = por %p1940_p2, %p1939_p1 }
  0x29   : > { %828 = vperm.xlu1 %1798, %v781_v8  }
  0x2a   : > { %p1942_p5 = pnand %p1941_p3, %p1935_p0 }
  0x2d   : > { %833 = vperm.xlu1 %1798, %v782_v9  }
  0x31   : > { %838 = vperm.xlu1 %1798, %v783_v10  }
  0x35   : > { %843 = vperm.xlu1 %1798, %v784_v11  }
  0x39   : > { %848 = vperm.xlu1 %1798, %v785_v12  }
  0x3d   : > { %853 = vperm.xlu1 %1798, %v786_v13  }
  0x41   : > { %858 = vperm.xlu1 %1798, %v787_v14   ;;  %v343_v14 = vlaneseq }
  0x43   : > { %vm2277_vm2 = vcmp.lt.s32.totalorder %v343_v14, 256 }
  0x44   : > { %347 = vst.msk [vmem:[#allocation2] sm:$0x3] %vm2277_vm2, %v2013_v1 }
  0x45   : > { %863 = vperm.xlu1 %1798, %v788_v15  }
  0x49   : > { %868 = vperm.xlu1 %1798, %v789_v16   ;;  %v2221_v16 = vshrl.u32 %v343_v14, 7 }
  0x4d   : > { %873 = vperm.xlu1 %1798, %v790_v17  }
  0x51   : > { %878 = vperm.xlu1 %1798, %v791_v18   ;;  %v974_v18 = vsub.s32 0, %v2221_v16 }
  0x55   : > { %883 = vperm.xlu1 %1798, %v792_v19   ;;  %v810_v19 = vld [vmem:[%s336_s26] sm:$0x3] }
  0x58   : > { %385 = vxpose.xlu0.b32.start.end [1/1] (short) %v351_v20, 128  ;;  %v978_v20 = vsub.s32 1, %v2221_v16 }
  0x59   : > { %888 = vperm.xlu1 %1798, %v793_v21   ;;  %v2230_v21 = vrot.slane %v810_v19, %v974_v18 }
  0x5d   : > { %893 = vperm.xlu1 %1798, %v794_v22  }
  0x61   : > { %903 = vperm.xlu1 %1798, %v796_v23   ;;  %v2234_v23 = vrot.slane %v810_v19, %v978_v20 }
  0x65   : > { %908 = vperm.xlu1 %1798, %v797_v24  }
  0x69   : > { %913 = vperm.xlu1 %1798, %v798_v25  }
  0x6d   : > { %918 = vperm.xlu1 %1798, %v799_v26  }
  0x71   : > { %923 = vperm.xlu1 %1798, %v800_v27  }
  0x75   : > { %928 = vperm.xlu1 %1798, %v801_v28  }
  0x79   : > { %933 = vperm.xlu1 %1798, %v802_v29  }
  0x7d   : > { %938 = vperm.xlu1 %1798, %v803_v30  }
  0x81   : > { %943 = vperm.xlu1 %1798, %v804_v31   ;;  %1799 = vset.pattern.permute.xlu0 %v2012_v0 }
  0x85   : > { %948 = vperm.xlu1 %1798, %v805_v32  }
  0x89   : > { %953 = vperm.xlu1 %1798, %v806_v33  }
  0x8d   : > { %958 = vperm.xlu1 %1798, %v807_v34  }
  0x91   : > { %963 = vperm.xlu1 %1798, %v808_v35  }
  0x95   : > { %968 = vperm.xlu1 %1798, %v809_v36  }
  0x9b   : > { %v369_v37 = vpop.trf.xlu0 }
  0x9c   : > { %1697 = vmatmul.mubr.msk.f32.vlgmr.msra.gmra.mrb[0].mxu0 %vm419_vm1, %v369_v37  ;;  %v814_v7 = vpop.permute.xlu1 %813 }
  0x9d   : > { %591 = vmatprep.mubr.f32.mxu0 %v2013_v1  ;;  %v982_v24 = vadd.f32 %v2230_v21, %v814_v7  ;;  %v983_v25 = vadd.f32 %v2234_v23, %v814_v7 }
  0x9f   : > { %v370_v38 = vpop.trf.xlu0 }
  0xa0   : > { %1698 = vmatmul.mubr.msk.f32.gmra.mrb[2].mxu0 %vm419_vm1, %v370_v38  ;;  %v819_v8 = vpop.permute.xlu1 %818 }
  0xa1   : > { %597 = vmatprep.mubr.f32.mxu0 %v2013_v1  ;;  %v984_v31 = vadd.f32 %v2230_v21, %v819_v8  ;;  %v985_v33 = vadd.f32 %v2234_v23, %v819_v8 }
  0xa3   : > { %v371_v39 = vpop.trf.xlu0 }
  0xa4   : > { %1699 = vmatmul.mubr.msk.f32.gmra.mrb[4].mxu0 %vm419_vm1, %v371_v39  ;;  %v824_v9 = vpop.permute.xlu1 %823 }
  0xa5   : > { %603 = vmatprep.mubr.f32.mxu0 %v2013_v1 }
  0xa7   : > { %v372_v40 = vpop.trf.xlu0 }
  0xa8   : > { %1700 = vmatmul.mubr.msk.f32.gmra.mrb[6].mxu0 %vm419_vm1, %v372_v40  ;;  %v829_v10 = vpop.permute.xlu1 %828 }
  0xa9   : > { %609 = vmatprep.mubr.f32.mxu0 %v2013_v1 }
  0xab   : > { %v373_v41 = vpop.trf.xlu0 }
  0xac   : > { %1701 = vmatmul.mubr.msk.f32.gmra.mrb[8].mxu0 %vm419_vm1, %v373_v41  ;;  %v2211_v11 = vpop.permute.xlu1 %833 }
  0xad   : > { %615 = vmatprep.mubr.f32.mxu0 %v2013_v1  ;;  %v990_v20 = vadd.f32 %v2230_v21, %v2211_v11 }
  0xaf   : > { %v374_v42 = vpop.trf.xlu0 }
  0xb0   : > { %1702 = vmatmul.mubr.msk.f32.gmra.mrb[10].mxu0 %vm419_vm1, %v374_v42  ;;  %v2213_v12 = vpop.permute.xlu1 %838 }
  0xb1   : > { %621 = vmatprep.mubr.f32.mxu0 %v2013_v1 }
  0xb3   : > { %v375_v43 = vpop.trf.xlu0 }
  0xb4   : > { %1703 = vmatmul.mubr.msk.f32.gmra.mrb[12].mxu0 %vm419_vm1, %v375_v43  ;;  %v2215_v13 = vpop.permute.xlu1 %843 }
  0xb5   : > { %627 = vmatprep.mubr.f32.mxu0 %v2013_v1 }
  0xb7   : > { %v376_v44 = vpop.trf.xlu0 }
  0xb8   : > { %1704 = vmatmul.mubr.msk.f32.gmra.mrb[14].mxu0 %vm419_vm1, %v376_v44  ;;  %v2217_v15 = vpop.permute.xlu1 %848 }
  0xb9   : > { %633 = vmatprep.mubr.f32.mxu0 %v2013_v1 }
  0xbb   : > { %v377_v46 = vpop.trf.xlu0 }
  0xbc   : > { %1705 = vmatmul.mubr.msk.f32.gmra.mrb[16].mxu0 %vm419_vm1, %v377_v46  ;;  %v2226_v17 = vpop.permute.xlu1 %853 }
  0xbd   : > { %639 = vmatprep.mubr.f32.mxu0 %v2013_v1  ;;  %898 = vperm.xlu0 %1799, %v795_v45  }
  0xbf   : > { %v378_v47 = vpop.trf.xlu0 }
  0xc0   : > { %1706 = vmatmul.mubr.msk.f32.gmra.mrb[18].mxu0 %vm419_vm1, %v378_v47  ;;  %v2232_v22 = vpop.permute.xlu1 %858  ;;  %v986_v47 = vadd.f32 %v2230_v21, %v824_v9 }
  0xc1   : > { %645 = vmatprep.mubr.f32.mxu0 %v2013_v1 }
  0xc3   : > { %v379_v48 = vpop.trf.xlu0 }
  0xc4   : > { %1707 = vmatmul.mubr.msk.f32.gmra.mrb[20].mxu0 %vm419_vm1, %v379_v48  ;;  %v2238_v27 = vpop.permute.xlu1 %863 }
  0xc5   : > { %651 = vmatprep.mubr.f32.mxu0 %v2013_v1 }
  0xc7   : > { %v380_v49 = vpop.trf.xlu0 }
  0xc8   : > { %1708 = vmatmul.mubr.msk.f32.gmra.mrb[22].mxu0 %vm419_vm1, %v380_v49  ;;  %v2242_v41 = vpop.permute.xlu1 %868 }
  0xc9   : > { %657 = vmatprep.mubr.f32.mxu0 %v2013_v1 }
  0xcb   : > { %v381_v50 = vpop.trf.xlu0 }
  0xcc   : > { %1709 = vmatmul.mubr.msk.f32.gmra.mrb[24].mxu0 %vm419_vm1, %v381_v50 }
  0xcd   : > { %663 = vmatprep.mubr.f32.mxu0 %v2013_v1 }
  0xcf   : > { %v382_v51 = vpop.trf.xlu0 }
  0xd0   : > { %1710 = vmatmul.mubr.msk.f32.gmra.mrb[26].mxu0 %vm419_vm1, %v382_v51 }
  0xd1   : > { %669 = vmatprep.mubr.f32.mxu0 %v2013_v1 }
  0xd3   : > { %v383_v52 = vpop.trf.xlu0 }
  0xd4   : > { %1711 = vmatmul.mubr.msk.f32.gmra.mrb[28].mxu0 %vm419_vm1, %v383_v52  ;;  %v987_v52 = vadd.f32 %v2234_v23, %v824_v9 }
  0xd5   : > { %675 = vmatprep.mubr.f32.mxu0 %v2013_v1 }
  0xd7   : > { %v384_v53 = vpop.trf.xlu0 }
  0xd8   : > { %1712 = vmatmul.mubr.msk.f32.gmra.mrb[30].mxu0 %vm419_vm1, %v384_v53 }
  0xdb   : > { %v401_v54 = vpop.trf.xlu0 }
  0xdc   : > { %1713 = vmatmul.mubr.msk.f32.vlgmr.msra.gmra.mrb[0].mxu1 %vm419_vm1, %v401_v54 }
  0xdd   : > { %687 = vmatprep.mubr.f32.mxu1 %v2013_v1 }
  0xdf   : > { %v402_v55 = vpop.trf.xlu0 }
  0xe0   : > { %1714 = vmatmul.mubr.msk.f32.gmra.mrb[2].mxu1 %vm419_vm1, %v402_v55 }
  0xe1   : > { %693 = vmatprep.mubr.f32.mxu1 %v2013_v1 }
  0xe3   : > { %v403_v56 = vpop.trf.xlu0 }
  0xe4   : > { %1715 = vmatmul.mubr.msk.f32.gmra.mrb[4].mxu1 %vm419_vm1, %v403_v56 }
  0xe5   : > { %699 = vmatprep.mubr.f32.mxu1 %v2013_v1 }
  0xe7   : > { %v404_v57 = vpop.trf.xlu0 }
  0xe8   : > { %1716 = vmatmul.mubr.msk.f32.gmra.mrb[6].mxu1 %vm419_vm1, %v404_v57 }
  0xe9   : > { %705 = vmatprep.mubr.f32.mxu1 %v2013_v1 }
  0xeb   : > { %v405_v58 = vpop.trf.xlu0 }
  0xec   : > { %1717 = vmatmul.mubr.msk.f32.gmra.mrb[8].mxu1 %vm419_vm1, %v405_v58  ;;  %v988_v58 = vadd.f32 %v2230_v21, %v829_v10 }
  0xed   : > { %711 = vmatprep.mubr.f32.mxu1 %v2013_v1 }
  0xef   : > { %v406_v59 = vpop.trf.xlu0 }
  0xf0   : > { %1718 = vmatmul.mubr.msk.f32.gmra.mrb[10].mxu1 %vm419_vm1, %v406_v59  ;;  %v989_v59 = vadd.f32 %v2234_v23, %v829_v10 }
  0xf1   : > { %717 = vmatprep.mubr.f32.mxu1 %v2013_v1 }
  0xf3   : > { %v407_v60 = vpop.trf.xlu0 }
  0xf4   : > { %1719 = vmatmul.mubr.msk.f32.gmra.mrb[12].mxu1 %vm419_vm1, %v407_v60 }
  0xf5   : > { %723 = vmatprep.mubr.f32.mxu1 %v2013_v1 }
  0xf7   : > { %v408_v61 = vpop.trf.xlu0 }
  0xf8   : > { %1720 = vmatmul.mubr.msk.f32.gmra.mrb[14].mxu1 %vm419_vm1, %v408_v61 }
  0xf9   : > { %729 = vmatprep.mubr.f32.mxu1 %v2013_v1 }
  0xfb   : > { %v409_v62 = vpop.trf.xlu0 }
  0xfc   : > { %1721 = vmatmul.mubr.msk.f32.gmra.mrb[16].mxu1 %vm419_vm1, %v409_v62 }
  0xfd   : > { %735 = vmatprep.mubr.f32.mxu1 %v2013_v1 }
  0xff   : > { %v410_v63 = vpop.trf.xlu0 }
 0x100   : > { %1722 = vmatmul.mubr.msk.f32.gmra.mrb[18].mxu1 %vm419_vm1, %v410_v63  ;;  %v2248_v63 = vpop.permute.xlu1 %873 }
 0x101   : > { %741 = vmatprep.mubr.f32.mxu1 %v2013_v1 }
 0x103   : > { %v411_v0 = vpop.trf.xlu0 }
 0x104   : > { %1723 = vmatmul.mubr.msk.f32.gmra.mrb[20].mxu1 %vm419_vm1, %v411_v0 }
 0x105   : > { %747 = vmatprep.mubr.f32.mxu1 %v2013_v1 }
 0x107   : > { %v412_v2 = vpop.trf.xlu0 }
 0x108   : > { %1724 = vmatmul.mubr.msk.f32.gmra.mrb[22].mxu1 %vm419_vm1, %v412_v2 }
 0x109   : > { %753 = vmatprep.mubr.f32.mxu1 %v2013_v1 }
 0x10b   : > { %v413_v3 = vpop.trf.xlu0 }
 0x10c   : > { %1725 = vmatmul.mubr.msk.f32.gmra.mrb[24].mxu1 %vm419_vm1, %v413_v3 }
 0x10d   : > { %759 = vmatprep.mubr.f32.mxu1 %v2013_v1 }
 0x10f   : > { %v414_v4 = vpop.trf.xlu0 }
 0x110   : > { %1726 = vmatmul.mubr.msk.f32.gmra.mrb[26].mxu1 %vm419_vm1, %v414_v4 }
 0x111   : > { %765 = vmatprep.mubr.f32.mxu1 %v2013_v1 }
 0x113   : > { %v415_v5 = vpop.trf.xlu0 }
 0x114   : > { %1727 = vmatmul.mubr.msk.f32.gmra.mrb[28].mxu1 %vm419_vm1, %v415_v5 }
 0x115   : > { %771 = vmatprep.mubr.f32.mxu1 %v2013_v1  ;;  %v1002_v1 = vadd.f32 %v2230_v21, %v2238_v27 }
 0x117   : > { %v416_v6 = vpop.trf.xlu0 }
 0x118   : > { %1728 = vmatmul.mubr.msk.f32.gmra.mrb[30].mxu1 %vm419_vm1, %v416_v6 }
 0x16f   : > { %v587_v26 = vpop.f32.mrb[0].mxu0 }
 0x170   : > { %v1046_v28 = vmul.f32 2.0, %v587_v26  ;;  %v589_v29 = vpop.f32.mrb[1].mxu0 }
 0x171   : > { %v1047_v30 = vmul.f32 2.0, %v589_v29  ;;  %v991_v29 = vadd.f32 %v2234_v23, %v2211_v11 }
 0x172   : > { %v1110_v32 = vsub.f32 %v982_v24, %v1046_v28 }
 0x173   : > { %v1111_v34 = vsub.f32 %v983_v25, %v1047_v30  ;;  %v593_v35 = vpop.f32.mrb[2].mxu0 }
 0x174   : > { %v1174_v36 = vmax.f32 %v1110_v32, 0.0  ;;  %v1048_v37 = vmul.f32 2.0, %v593_v35  ;;  %v595_v38 = vpop.f32.mrb[3].mxu0 }
 0x175   : > { %v1175_v39 = vmax.f32 %v1111_v34, 0.0  ;;  %v1049_v40 = vmul.f32 2.0, %v595_v38 }
 0x176   : > { %v1238_v42 = vsub.f32 0.0, %v1174_v36  ;;  %v1112_v43 = vsub.f32 %v984_v31, %v1048_v37  ;;  %v992_v36 = vadd.f32 %v2230_v21, %v2213_v12 }
 0x177   : > { %v1239_v44 = vsub.f32 0.0, %v1175_v39  ;;  %v1113_v45 = vsub.f32 %v985_v33, %v1049_v40  ;;  %v599_v46 = vpop.f32.mrb[4].mxu0  ;;  %v2254_v33 = vpop.permute.xlu1 %878  ;;  %v993_v40 = vadd.f32 %v2234_v23, %v2213_v12  ;;  %v996_v12 = vadd.f32 %v2230_v21, %v2217_v15 }
 0x178   : > { %v1302_v48 = vmul.f32 1.442695, %v1238_v42  ;;  %v1176_v49 = vmax.f32 %v1112_v43, 0.0  ;;  %v1050_v50 = vmul.f32 2.0, %v599_v46  ;;  %v601_v51 = vpop.f32.mrb[5].mxu0 }
 0x179   : > { %v1304_v53 = vmul.f32 1.442695, %v1239_v44  ;;  %v1177_v54 = vmax.f32 %v1113_v45, 0.0  ;;  %v1051_v55 = vmul.f32 2.0, %v601_v51  ;;  %v994_v45 = vadd.f32 %v2230_v21, %v2215_v13 }
 0x17a   : > { %v1240_v56 = vsub.f32 0.0, %v1176_v49  ;;  %v1114_v57 = vsub.f32 %v986_v47, %v1050_v50  ;;  %1802 = vpow2.f32 %v1302_v48  ;;  %v995_v50 = vadd.f32 %v2234_v23, %v2215_v13 }
 0x17b   : > { %v1241_v60 = vsub.f32 0.0, %v1177_v54  ;;  %v1115_v61 = vsub.f32 %v987_v52, %v1051_v55  ;;  %v605_v62 = vpop.f32.mrb[6].mxu0  ;;  %1804 = vpow2.f32 %v1304_v53 }
 0x17c   : > { %v1306_v0 = vmul.f32 1.442695, %v1240_v56  ;;  %v1178_v2 = vmax.f32 %v1114_v57, 0.0  ;;  %v1052_v3 = vmul.f32 2.0, %v605_v62  ;;  %v607_v4 = vpop.f32.mrb[7].mxu0 }
 0x17d   : > { %v1308_v5 = vmul.f32 1.442695, %v1241_v60  ;;  %v1179_v6 = vmax.f32 %v1115_v61, 0.0  ;;  %v1053_v7 = vmul.f32 2.0, %v607_v4 }
 0x17e   : > { %1806 = vpow2.f32 %v1306_v0  ;;  %v1242_v8 = vsub.f32 0.0, %v1178_v2  ;;  %v1116_v9 = vsub.f32 %v988_v58, %v1052_v3  ;;  %v997_v58 = vadd.f32 %v2234_v23, %v2217_v15 }
 0x17f   : > { %1808 = vpow2.f32 %v1308_v5  ;;  %v1243_v18 = vsub.f32 0.0, %v1179_v6  ;;  %v1117_v10 = vsub.f32 %v989_v59, %v1053_v7  ;;  %v611_v19 = vpop.f32.mrb[8].mxu0  ;;  %v2268_v59 = vpop.permute.xlu1 %883 }
 0x180   : > { %v1310_v24 = vmul.f32 1.442695, %v1242_v8  ;;  %v1180_v25 = vmax.f32 %v1116_v9, 0.0  ;;  %v1054_v26 = vmul.f32 2.0, %v611_v19  ;;  %v613_v28 = vpop.f32.mrb[9].mxu0  ;;  %v998_v9 = vadd.f32 %v2230_v21, %v2226_v17 }
 0x181   : > { %v1312_v30 = vmul.f32 1.442695, %v1243_v18  ;;  %v1181_v31 = vmax.f32 %v1117_v10, 0.0  ;;  %v1055_v32 = vmul.f32 2.0, %v613_v28 }
 0x182   : > { %1810 = vpow2.f32 %v1310_v24  ;;  %v1244_v34 = vsub.f32 0.0, %v1180_v25  ;;  %v1118_v35 = vsub.f32 %v990_v20, %v1054_v26  ;;  %v999_v20 = vadd.f32 %v2234_v23, %v2226_v17 }
 0x183   : > { %1812 = vpow2.f32 %v1312_v30  ;;  %v1245_v37 = vsub.f32 0.0, %v1181_v31  ;;  %v1119_v38 = vsub.f32 %v991_v29, %v1055_v32  ;;  %v617_v39 = vpop.f32.mrb[10].mxu0 }
 0x184   : > { %v1314_v42 = vmul.f32 1.442695, %v1244_v34  ;;  %v1182_v11 = vmax.f32 %v1118_v35, 0.0  ;;  %v1056_v43 = vmul.f32 2.0, %v617_v39  ;;  %v619_v44 = vpop.f32.mrb[11].mxu0  ;;  %v1803_v49 = vpop.eup %1802 }
 0x185   : > { %v1316_v46 = vmul.f32 1.442695, %v1245_v37  ;;  %v1183_v47 = vmax.f32 %v1119_v38, 0.0  ;;  %v1057_v48 = vmul.f32 2.0, %v619_v44  ;;  %v1805_v53 = vpop.eup %1804  ;;  %v2274_v35 = vpop.permute.xlu1 %888 }
 0x186   : > { %1814 = vpow2.f32 %v1314_v42  ;;  %v1246_v51 = vsub.f32 0.0, %v1182_v11  ;;  %v1120_v52 = vsub.f32 %v992_v36, %v1056_v43  ;;  %v1000_v43 = vadd.f32 %v2230_v21, %v2232_v22 }
 0x187   : > { %1816 = vpow2.f32 %v1316_v46  ;;  %v1247_v54 = vsub.f32 0.0, %v1183_v47  ;;  %v1121_v55 = vsub.f32 %v993_v40, %v1057_v48  ;;  %v623_v56 = vpop.f32.mrb[12].mxu0 }
 0x188   : > { %v1807_v57 = vpop.eup %1806  ;;  %v1318_v60 = vmul.f32 1.442695, %v1246_v51  ;;  %v1184_v61 = vmax.f32 %v1120_v52, 0.0  ;;  %v1058_v13 = vmul.f32 2.0, %v623_v56  ;;  %v625_v62 = vpop.f32.mrb[13].mxu0 }
 0x189   : > { %v1809_v0 = vpop.eup %1808  ;;  %v1431_v2 = vadd.f32 %v1807_v57, %v1803_v49  ;;  %v1320_v3 = vmul.f32 1.442695, %v1247_v54  ;;  %v1185_v4 = vmax.f32 %v1121_v55, 0.0  ;;  %v1059_v5 = vmul.f32 2.0, %v625_v62 }
 0x18a   : > { %v1468_v6 = vadd.f32 %v1809_v0, %v1805_v53  ;;  %1818 = vpow2.f32 %v1318_v60  ;;  %v1248_v7 = vsub.f32 0.0, %v1184_v61  ;;  %v1122_v8 = vsub.f32 %v994_v45, %v1058_v13  ;;  %v2290_v60 = vpop.permute.xlu1 %893 }
 0x18b   : > { %1820 = vpow2.f32 %v1320_v3  ;;  %v1249_v15 = vsub.f32 0.0, %v1185_v4  ;;  %v1123_v18 = vsub.f32 %v995_v50, %v1059_v5  ;;  %v629_v10 = vpop.f32.mrb[14].mxu0  ;;  %v1001_v54 = vadd.f32 %v2234_v23, %v2232_v22 }
 0x18c   : > { %v1811_v19 = vpop.eup %1810  ;;  %v1322_v24 = vmul.f32 1.442695, %v1248_v7  ;;  %v1186_v25 = vmax.f32 %v1122_v8, 0.0  ;;  %v1060_v26 = vmul.f32 2.0, %v629_v10  ;;  %v631_v28 = vpop.f32.mrb[15].mxu0 }
 0x18d   : > { %v1813_v29 = vpop.eup %1812  ;;  %v1432_v30 = vadd.f32 %v1811_v19, %v1431_v2  ;;  %v1324_v31 = vmul.f32 1.442695, %v1249_v15  ;;  %v1187_v32 = vmax.f32 %v1123_v18, 0.0  ;;  %v1061_v34 = vmul.f32 2.0, %v631_v28 }
 0x18e   : > { %v1469_v36 = vadd.f32 %v1813_v29, %v1468_v6  ;;  %1822 = vpow2.f32 %v1322_v24  ;;  %v1250_v37 = vsub.f32 0.0, %v1186_v25  ;;  %v1124_v38 = vsub.f32 %v996_v12, %v1060_v26 }
 0x18f   : > { %1824 = vpow2.f32 %v1324_v31  ;;  %v1251_v39 = vsub.f32 0.0, %v1187_v32  ;;  %v1125_v40 = vsub.f32 %v997_v58, %v1061_v34  ;;  %v635_v42 = vpop.f32.mrb[16].mxu0 }
 0x190   : > { %v1815_v11 = vpop.eup %1814  ;;  %v1326_v44 = vmul.f32 1.442695, %v1250_v37  ;;  %v1188_v45 = vmax.f32 %v1124_v38, 0.0  ;;  %v1062_v46 = vmul.f32 2.0, %v635_v42  ;;  %v637_v47 = vpop.f32.mrb[17].mxu0 }
 0x191   : > { %v1817_v48 = vpop.eup %1816  ;;  %v1433_v49 = vadd.f32 %v1815_v11, %v1432_v30  ;;  %v1328_v50 = vmul.f32 1.442695, %v1251_v39  ;;  %v1189_v51 = vmax.f32 %v1125_v40, 0.0  ;;  %v1063_v14 = vmul.f32 2.0, %v637_v47 }
 0x192   : > { %v1470_v52 = vadd.f32 %v1817_v48, %v1469_v36  ;;  %1826 = vpow2.f32 %v1326_v44  ;;  %v1252_v53 = vsub.f32 0.0, %v1188_v45  ;;  %v1126_v12 = vsub.f32 %v998_v9, %v1062_v46  ;;  %v2296_v36 = vpop.permute.xlu1 %903 }
 0x193   : > { %1828 = vpow2.f32 %v1328_v50  ;;  %v1253_v55 = vsub.f32 0.0, %v1189_v51  ;;  %v1127_v56 = vsub.f32 %v999_v20, %v1063_v14  ;;  %v641_v57 = vpop.f32.mrb[18].mxu0  ;;  %v1003_v9 = vadd.f32 %v2234_v23, %v2238_v27 }
 0x194   : > { %v1819_v58 = vpop.eup %1818  ;;  %v1330_v61 = vmul.f32 1.442695, %v1252_v53  ;;  %v1190_v13 = vmax.f32 %v1126_v12, 0.0  ;;  %v1064_v62 = vmul.f32 2.0, %v641_v57  ;;  %v643_v0 = vpop.f32.mrb[19].mxu0  ;;  %v1004_v20 = vadd.f32 %v2230_v21, %v2242_v41 }
 0x195   : > { %v1821_v2 = vpop.eup %1820  ;;  %v1434_v3 = vadd.f32 %v1819_v58, %v1433_v49  ;;  %v1332_v4 = vmul.f32 1.442695, %v1253_v55  ;;  %v1191_v5 = vmax.f32 %v1127_v56, 0.0  ;;  %v1065_v6 = vmul.f32 2.0, %v643_v0 }
 0x196   : > { %v1471_v22 = vadd.f32 %v1821_v2, %v1470_v52  ;;  %1830 = vpow2.f32 %v1330_v61  ;;  %v1254_v7 = vsub.f32 0.0, %v1190_v13  ;;  %v1128_v8 = vsub.f32 %v1000_v43, %v1064_v62  ;;  %v2306_v61 = vpop.permute.xlu1 %908 }
 0x197   : > { %1832 = vpow2.f32 %v1332_v4  ;;  %v1255_v15 = vsub.f32 0.0, %v1191_v5  ;;  %v1129_v18 = vsub.f32 %v1001_v54, %v1065_v6  ;;  %v647_v10 = vpop.f32.mrb[20].mxu0  ;;  %v1005_v39 = vadd.f32 %v2234_v23, %v2242_v41 }
 0x198   : > { %v1823_v19 = vpop.eup %1822  ;;  %v1334_v24 = vmul.f32 1.442695, %v1254_v7  ;;  %v1192_v25 = vmax.f32 %v1128_v8, 0.0  ;;  %v1066_v26 = vmul.f32 2.0, %v647_v10  ;;  %v649_v28 = vpop.f32.mrb[21].mxu0  ;;  %v1006_v44 = vadd.f32 %v2230_v21, %v2248_v63 }
 0x199   : > { %v1825_v29 = vpop.eup %1824  ;;  %v1435_v30 = vadd.f32 %v1823_v19, %v1434_v3  ;;  %v1336_v31 = vmul.f32 1.442695, %v1255_v15  ;;  %v1193_v32 = vmax.f32 %v1129_v18, 0.0  ;;  %v1067_v34 = vmul.f32 2.0, %v649_v28 }
 0x19a   : > { %v1472_v27 = vadd.f32 %v1825_v29, %v1471_v22  ;;  %1834 = vpow2.f32 %v1334_v24  ;;  %v1256_v37 = vsub.f32 0.0, %v1192_v25  ;;  %v1130_v38 = vsub.f32 %v1002_v1, %v1066_v26 }
 0x19b   : > { %1836 = vpow2.f32 %v1336_v31  ;;  %v1257_v40 = vsub.f32 0.0, %v1193_v32  ;;  %v1131_v42 = vsub.f32 %v1003_v9, %v1067_v34  ;;  %v653_v11 = vpop.f32.mrb[22].mxu0  ;;  %v1007_v54 = vadd.f32 %v2234_v23, %v2248_v63 }
 0x19c   : > { %v1827_v43 = vpop.eup %1826  ;;  %v1338_v45 = vmul.f32 1.442695, %v1256_v37  ;;  %v1194_v46 = vmax.f32 %v1130_v38, 0.0  ;;  %v1068_v47 = vmul.f32 2.0, %v653_v11  ;;  %v655_v48 = vpop.f32.mrb[23].mxu0  ;;  %v1008_v1 = vadd.f32 %v2230_v21, %v2254_v33 }
 0x19d   : > { %v1829_v49 = vpop.eup %1828  ;;  %v1436_v50 = vadd.f32 %v1827_v43, %v1435_v30  ;;  %v1340_v51 = vmul.f32 1.442695, %v1257_v40  ;;  %v1195_v14 = vmax.f32 %v1131_v42, 0.0  ;;  %v1069_v52 = vmul.f32 2.0, %v655_v48 }
 0x19e   : > { %v1473_v53 = vadd.f32 %v1829_v49, %v1472_v27  ;;  %1838 = vpow2.f32 %v1338_v45  ;;  %v1258_v41 = vsub.f32 0.0, %v1194_v46  ;;  %v1132_v12 = vsub.f32 %v1004_v20, %v1068_v47  ;;  %v2312_v27 = vpop.permute.xlu1 %913 }
 0x19f   : > { %1840 = vpow2.f32 %v1340_v51  ;;  %v1259_v55 = vsub.f32 0.0, %v1195_v14  ;;  %v1133_v56 = vsub.f32 %v1005_v39, %v1069_v52  ;;  %v659_v57 = vpop.f32.mrb[24].mxu0  ;;  %v1009_v9 = vadd.f32 %v2234_v23, %v2254_v33 }
 0x1a0   : > { %v1831_v58 = vpop.eup %1830  ;;  %v1342_v13 = vmul.f32 1.442695, %v1258_v41  ;;  %v1196_v62 = vmax.f32 %v1132_v12, 0.0  ;;  %v1070_v0 = vmul.f32 2.0, %v659_v57  ;;  %v661_v2 = vpop.f32.mrb[25].mxu0  ;;  %v1010_v20 = vadd.f32 %v2230_v21, %v2268_v59 }
 0x1a1   : > { %v1833_v3 = vpop.eup %1832  ;;  %v1437_v4 = vadd.f32 %v1831_v58, %v1436_v50  ;;  %v1344_v5 = vmul.f32 1.442695, %v1259_v55  ;;  %v1197_v6 = vmax.f32 %v1133_v56, 0.0  ;;  %v1071_v22 = vmul.f32 2.0, %v661_v2 }
 0x1a2   : > { %v1474_v63 = vadd.f32 %v1833_v3, %v1473_v53  ;;  %1842 = vpow2.f32 %v1342_v13  ;;  %v1260_v7 = vsub.f32 0.0, %v1196_v62  ;;  %v1134_v8 = vsub.f32 %v1006_v44, %v1070_v0 }
 0x1a3   : > { %1844 = vpow2.f32 %v1344_v5  ;;  %v1261_v15 = vsub.f32 0.0, %v1197_v6  ;;  %v1135_v18 = vsub.f32 %v1007_v54, %v1071_v22  ;;  %v665_v10 = vpop.f32.mrb[26].mxu0  ;;  %v1011_v39 = vadd.f32 %v2234_v23, %v2268_v59 }
 0x1a4   : > { %v1835_v19 = vpop.eup %1834  ;;  %v1346_v24 = vmul.f32 1.442695, %v1260_v7  ;;  %v1198_v25 = vmax.f32 %v1134_v8, 0.0  ;;  %v1072_v26 = vmul.f32 2.0, %v665_v10  ;;  %v667_v28 = vpop.f32.mrb[27].mxu0  ;;  %v1012_v44 = vadd.f32 %v2230_v21, %v2274_v35 }
 0x1a5   : > { %v1837_v29 = vpop.eup %1836  ;;  %v1438_v30 = vadd.f32 %v1835_v19, %v1437_v4  ;;  %v1348_v31 = vmul.f32 1.442695, %v1261_v15  ;;  %v1199_v32 = vmax.f32 %v1135_v18, 0.0  ;;  %v1073_v34 = vmul.f32 2.0, %v667_v28 }
 0x1a6   : > { %v1475_v33 = vadd.f32 %v1837_v29, %v1474_v63  ;;  %1846 = vpow2.f32 %v1346_v24  ;;  %v1262_v37 = vsub.f32 0.0, %v1198_v25  ;;  %v1136_v38 = vsub.f32 %v1008_v1, %v1072_v26  ;;  %v2322_v1 = vpop.permute.xlu1 %918 }
 0x1a7   : > { %1848 = vpow2.f32 %v1348_v31  ;;  %v1263_v40 = vsub.f32 0.0, %v1199_v32  ;;  %v1137_v42 = vsub.f32 %v1009_v9, %v1073_v34  ;;  %v671_v11 = vpop.f32.mrb[28].mxu0  ;;  %v1013_v12 = vadd.f32 %v2234_v23, %v2274_v35  ;;  %v899_v35 = vpop.permute.xlu0 %898 }
 0x1a8   : > { %v1839_v43 = vpop.eup %1838  ;;  %v1350_v45 = vmul.f32 1.442695, %v1262_v37  ;;  %v1200_v46 = vmax.f32 %v1136_v38, 0.0  ;;  %v1074_v47 = vmul.f32 2.0, %v671_v11  ;;  %v673_v48 = vpop.f32.mrb[29].mxu0  ;;  %v1014_v58 = vadd.f32 %v2230_v21, %v2290_v60 }
 0x1a9   : > { %v1841_v49 = vpop.eup %1840  ;;  %v1439_v50 = vadd.f32 %v1839_v43, %v1438_v30  ;;  %v1352_v51 = vmul.f32 1.442695, %v1263_v40  ;;  %v1201_v14 = vmax.f32 %v1137_v42, 0.0  ;;  %v1075_v52 = vmul.f32 2.0, %v673_v48 }
 0x1aa   : > { %v1476_v53 = vadd.f32 %v1841_v49, %v1475_v33  ;;  %1850 = vpow2.f32 %v1350_v45  ;;  %v1264_v59 = vsub.f32 0.0, %v1200_v46  ;;  %v1138_v41 = vsub.f32 %v1010_v20, %v1074_v47  ;;  %v2327_v33 = vpop.permute.xlu1 %923 }
 0x1ab   : > { %1852 = vpow2.f32 %v1352_v51  ;;  %v1265_v54 = vsub.f32 0.0, %v1201_v14  ;;  %v1139_v55 = vsub.f32 %v1011_v39, %v1075_v52  ;;  %v677_v56 = vpop.f32.mrb[30].mxu0  ;;  %v1015_v9 = vadd.f32 %v2234_v23, %v2290_v60 }
 0x1ac   : > { %v1843_v57 = vpop.eup %1842  ;;  %v1354_v13 = vmul.f32 1.442695, %v1264_v59  ;;  %v1202_v62 = vmax.f32 %v1138_v41, 0.0  ;;  %v1076_v0 = vmul.f32 2.0, %v677_v56  ;;  %v679_v2 = vpop.f32.mrb[31].mxu0  ;;  %v1016_v28 = vadd.f32 %v2230_v21, %v899_v35 }
 0x1ad   : > { %v1845_v3 = vpop.eup %1844  ;;  %v1440_v4 = vadd.f32 %v1843_v57, %v1439_v50  ;;  %v1356_v5 = vmul.f32 1.442695, %v1265_v54  ;;  %v1203_v6 = vmax.f32 %v1139_v55, 0.0  ;;  %v1077_v22 = vmul.f32 2.0, %v679_v2 }
 0x1ae   : > { %v1477_v63 = vadd.f32 %v1845_v3, %v1476_v53  ;;  %1854 = vpow2.f32 %v1354_v13  ;;  %v1266_v7 = vsub.f32 0.0, %v1202_v62  ;;  %v1140_v8 = vsub.f32 %v1012_v44, %v1076_v0 }
 0x1af   : > { %1856 = vpow2.f32 %v1356_v5  ;;  %v1267_v15 = vsub.f32 0.0, %v1203_v6  ;;  %v1141_v18 = vsub.f32 %v1013_v12, %v1077_v22  ;;  %v683_v10 = vpop.f32.mrb[0].mxu1  ;;  %v1017_v11 = vadd.f32 %v2234_v23, %v899_v35 }
 0x1b0   : > { %v1847_v19 = vpop.eup %1846  ;;  %v1358_v20 = vmul.f32 1.442695, %v1266_v7  ;;  %v1204_v24 = vmax.f32 %v1140_v8, 0.0  ;;  %v1078_v25 = vmul.f32 2.0, %v683_v10  ;;  %v685_v26 = vpop.f32.mrb[1].mxu1  ;;  %v1018_v41 = vadd.f32 %v2230_v21, %v2296_v36 }
 0x1b1   : > { %v1849_v29 = vpop.eup %1848  ;;  %v1441_v30 = vadd.f32 %v1847_v19, %v1440_v4  ;;  %v1360_v31 = vmul.f32 1.442695, %v1267_v15  ;;  %v1205_v32 = vmax.f32 %v1141_v18, 0.0  ;;  %v1079_v34 = vmul.f32 2.0, %v685_v26 }
 0x1b2   : > { %v1478_v37 = vadd.f32 %v1849_v29, %v1477_v63  ;;  %1858 = vpow2.f32 %v1358_v20  ;;  %v1268_v60 = vsub.f32 0.0, %v1204_v24  ;;  %v1142_v38 = vsub.f32 %v1014_v58, %v1078_v25  ;;  %v2334_v58 = vpop.permute.xlu1 %928 }
 0x1b3   : > { %1860 = vpow2.f32 %v1360_v31  ;;  %v1269_v39 = vsub.f32 0.0, %v1205_v32  ;;  %v1143_v40 = vsub.f32 %v1015_v9, %v1079_v34  ;;  %v689_v42 = vpop.f32.mrb[2].mxu1  ;;  %v1019_v57 = vadd.f32 %v2234_v23, %v2296_v36 }
 0x1b4   : > { %v1851_v43 = vpop.eup %1850  ;;  %v1362_v44 = vmul.f32 1.442695, %v1268_v60  ;;  %v1206_v45 = vmax.f32 %v1142_v38, 0.0  ;;  %v1080_v46 = vmul.f32 2.0, %v689_v42  ;;  %v691_v47 = vpop.f32.mrb[3].mxu1  ;;  %v1020_v8 = vadd.f32 %v2230_v21, %v2306_v61 }
 0x1b5   : > { %v1853_v48 = vpop.eup %1852  ;;  %v1442_v49 = vadd.f32 %v1851_v43, %v1441_v30  ;;  %v1364_v50 = vmul.f32 1.442695, %v1269_v39  ;;  %v1207_v51 = vmax.f32 %v1143_v40, 0.0  ;;  %v1081_v14 = vmul.f32 2.0, %v691_v47 }
 0x1b6   : > { %v1479_v52 = vadd.f32 %v1853_v48, %v1478_v37  ;;  %1862 = vpow2.f32 %v1362_v44  ;;  %v1270_v53 = vsub.f32 0.0, %v1206_v45  ;;  %v1144_v59 = vsub.f32 %v1016_v28, %v1080_v46  ;;  %v2340_v32 = vpop.permute.xlu1 %933 }
 0x1b7   : > { %1864 = vpow2.f32 %v1364_v50  ;;  %v1271_v12 = vsub.f32 0.0, %v1207_v51  ;;  %v1145_v54 = vsub.f32 %v1017_v11, %v1081_v14  ;;  %v695_v55 = vpop.f32.mrb[4].mxu1  ;;  %v1021_v10 = vadd.f32 %v2234_v23, %v2306_v61 }
 0x1b8   : > { %v1855_v56 = vpop.eup %1854  ;;  %v1366_v13 = vmul.f32 1.442695, %v1270_v53  ;;  %v1208_v62 = vmax.f32 %v1144_v59, 0.0  ;;  %v1082_v0 = vmul.f32 2.0, %v695_v55  ;;  %v697_v2 = vpop.f32.mrb[5].mxu1  ;;  %v1022_v38 = vadd.f32 %v2230_v21, %v2312_v27 }
 0x1b9   : > { %v1857_v3 = vpop.eup %1856  ;;  %v1443_v4 = vadd.f32 %v1855_v56, %v1442_v49  ;;  %v1368_v5 = vmul.f32 1.442695, %v1271_v12  ;;  %v1209_v6 = vmax.f32 %v1145_v54, 0.0  ;;  %v1083_v22 = vmul.f32 2.0, %v697_v2 }
 0x1ba   : > { %v1480_v35 = vadd.f32 %v1857_v3, %v1479_v52  ;;  %1866 = vpow2.f32 %v1366_v13  ;;  %v1272_v63 = vsub.f32 0.0, %v1208_v62  ;;  %v1146_v7 = vsub.f32 %v1018_v41, %v1082_v0  ;;  %v2350_v56 = vpop.permute.xlu1 %938 }
 0x1bb   : > { %1868 = vpow2.f32 %v1368_v5  ;;  %v1273_v36 = vsub.f32 0.0, %v1209_v6  ;;  %v1147_v9 = vsub.f32 %v1019_v57, %v1083_v22  ;;  %v701_v15 = vpop.f32.mrb[6].mxu1  ;;  %v1023_v11 = vadd.f32 %v2234_v23, %v2312_v27 }
 0x1bc   : > { %v1859_v18 = vpop.eup %1858  ;;  %v1370_v19 = vmul.f32 1.442695, %v1272_v63  ;;  %v1210_v20 = vmax.f32 %v1146_v7, 0.0  ;;  %v1084_v24 = vmul.f32 2.0, %v701_v15  ;;  %v703_v25 = vpop.f32.mrb[7].mxu1  ;;  %v1024_v59 = vadd.f32 %v2230_v21, %v2322_v1 }
 0x1bd   : > { %v1861_v26 = vpop.eup %1860  ;;  %v1444_v28 = vadd.f32 %v1859_v18, %v1443_v4  ;;  %v1372_v29 = vmul.f32 1.442695, %v1273_v36  ;;  %v1211_v30 = vmax.f32 %v1147_v9, 0.0  ;;  %v1085_v31 = vmul.f32 2.0, %v703_v25 }
 0x1be   : > { %v1481_v34 = vadd.f32 %v1861_v26, %v1480_v35  ;;  %1870 = vpow2.f32 %v1370_v19  ;;  %v1274_v37 = vsub.f32 0.0, %v1210_v20  ;;  %v1148_v60 = vsub.f32 %v1020_v8, %v1084_v24 }
 0x1bf   : > { %1872 = vpow2.f32 %v1372_v29  ;;  %v1275_v61 = vsub.f32 0.0, %v1211_v30  ;;  %v1149_v39 = vsub.f32 %v1021_v10, %v1085_v31  ;;  %v707_v40 = vpop.f32.mrb[8].mxu1  ;;  %v1025_v55 = vadd.f32 %v2234_v23, %v2322_v1  ;;  %v2356_v30 = vpop.permute.xlu1 %943 }
 0x1c0   : > { %v1863_v42 = vpop.eup %1862  ;;  %v1374_v43 = vmul.f32 1.442695, %v1274_v37  ;;  %v1212_v44 = vmax.f32 %v1148_v60, 0.0  ;;  %v1086_v45 = vmul.f32 2.0, %v707_v40  ;;  %v709_v46 = vpop.f32.mrb[9].mxu1  ;;  %v1026_v7 = vadd.f32 %v2230_v21, %v2327_v33 }
 0x1c1   : > { %v1865_v47 = vpop.eup %1864  ;;  %v1445_v48 = vadd.f32 %v1863_v42, %v1444_v28  ;;  %v1376_v49 = vmul.f32 1.442695, %v1275_v61  ;;  %v1213_v50 = vmax.f32 %v1149_v39, 0.0  ;;  %v1087_v51 = vmul.f32 2.0, %v709_v46 }
 0x1c2   : > { %v1482_v14 = vadd.f32 %v1865_v47, %v1481_v34  ;;  %1874 = vpow2.f32 %v1374_v43  ;;  %v1276_v52 = vsub.f32 0.0, %v1212_v44  ;;  %v1150_v53 = vsub.f32 %v1022_v38, %v1086_v45 }
 0x1c3   : > { %1876 = vpow2.f32 %v1376_v49  ;;  %v1277_v41 = vsub.f32 0.0, %v1213_v50  ;;  %v1151_v12 = vsub.f32 %v1023_v11, %v1087_v51  ;;  %v713_v27 = vpop.f32.mrb[10].mxu1  ;;  %v1027_v15 = vadd.f32 %v2234_v23, %v2327_v33 }
 0x1c4   : > { %v1867_v54 = vpop.eup %1866  ;;  %v1378_v57 = vmul.f32 1.442695, %v1276_v52  ;;  %v1214_v13 = vmax.f32 %v1150_v53, 0.0  ;;  %v1088_v62 = vmul.f32 2.0, %v713_v27  ;;  %v715_v0 = vpop.f32.mrb[11].mxu1  ;;  %v1028_v60 = vadd.f32 %v2230_v21, %v2334_v58 }
 0x1c5   : > { %v1869_v2 = vpop.eup %1868  ;;  %v1446_v3 = vadd.f32 %v1867_v54, %v1445_v48  ;;  %v1380_v4 = vmul.f32 1.442695, %v1277_v41  ;;  %v1215_v5 = vmax.f32 %v1151_v12, 0.0  ;;  %v1089_v6 = vmul.f32 2.0, %v715_v0  ;;  %v949_v27 = vpop.permute.xlu1 %948 }
 0x1c6   : > { %v1483_v22 = vadd.f32 %v1869_v2, %v1482_v14  ;;  %1878 = vpow2.f32 %v1378_v57  ;;  %v1278_v35 = vsub.f32 0.0, %v1214_v13  ;;  %v1152_v63 = vsub.f32 %v1024_v59, %v1088_v62 }
 0x1c7   : > { %1880 = vpow2.f32 %v1380_v4  ;;  %v1279_v1 = vsub.f32 0.0, %v1215_v5  ;;  %v1153_v8 = vsub.f32 %v1025_v55, %v1089_v6  ;;  %v719_v36 = vpop.f32.mrb[12].mxu1  ;;  %v1029_v40 = vadd.f32 %v2234_v23, %v2334_v58 }
 0x1c8   : > { %v1871_v9 = vpop.eup %1870  ;;  %v1382_v18 = vmul.f32 1.442695, %v1278_v35  ;;  %v1216_v10 = vmax.f32 %v1152_v63, 0.0  ;;  %v1090_v19 = vmul.f32 2.0, %v719_v36  ;;  %v721_v20 = vpop.f32.mrb[13].mxu1  ;;  %v1030_v52 = vadd.f32 %v2230_v21, %v2340_v32 }
 0x1c9   : > { %v1873_v24 = vpop.eup %1872  ;;  %v1447_v25 = vadd.f32 %v1871_v9, %v1446_v3  ;;  %v1384_v26 = vmul.f32 1.442695, %v1279_v1  ;;  %v1217_v28 = vmax.f32 %v1153_v8, 0.0  ;;  %v1091_v29 = vmul.f32 2.0, %v721_v20 }
 0x1ca   : > { %v1484_v31 = vadd.f32 %v1873_v24, %v1483_v22  ;;  %1882 = vpow2.f32 %v1382_v18  ;;  %v1280_v34 = vsub.f32 0.0, %v1216_v10  ;;  %v1154_v37 = vsub.f32 %v1026_v7, %v1090_v19 }
 0x1cb   : > { %1884 = vpow2.f32 %v1384_v26  ;;  %v1281_v33 = vsub.f32 0.0, %v1217_v28  ;;  %v1155_v38 = vsub.f32 %v1027_v15, %v1091_v29  ;;  %v725_v61 = vpop.f32.mrb[14].mxu1  ;;  %v1031_v12 = vadd.f32 %v2234_v23, %v2340_v32  ;;  %v954_v26 = vpop.permute.xlu1 %953 }
 0x1cc   : > { %v1875_v39 = vpop.eup %1874  ;;  %v1386_v42 = vmul.f32 1.442695, %v1280_v34  ;;  %v1218_v11 = vmax.f32 %v1154_v37, 0.0  ;;  %v1092_v43 = vmul.f32 2.0, %v725_v61  ;;  %v727_v44 = vpop.f32.mrb[15].mxu1  ;;  %v1032_v35 = vadd.f32 %v2230_v21, %v2350_v56 }
 0x1cd   : > { %v1877_v45 = vpop.eup %1876  ;;  %v1448_v46 = vadd.f32 %v1875_v39, %v1447_v25  ;;  %v1388_v47 = vmul.f32 1.442695, %v1281_v33  ;;  %v1219_v48 = vmax.f32 %v1155_v38, 0.0  ;;  %v1093_v49 = vmul.f32 2.0, %v727_v44 }
 0x1ce   : > { %v1485_v50 = vadd.f32 %v1877_v45, %v1484_v31  ;;  %1886 = vpow2.f32 %v1386_v42  ;;  %v1282_v51 = vsub.f32 0.0, %v1218_v11  ;;  %v1156_v14 = vsub.f32 %v1028_v60, %v1092_v43 }
 0x1cf   : > { %1888 = vpow2.f32 %v1388_v47  ;;  %v1283_v53 = vsub.f32 0.0, %v1219_v48  ;;  %v1157_v59 = vsub.f32 %v1029_v40, %v1093_v49  ;;  %v731_v58 = vpop.f32.mrb[16].mxu1  ;;  %v1033_v8 = vadd.f32 %v2234_v23, %v2350_v56 }
 0x1d0   : > { %v1879_v41 = vpop.eup %1878  ;;  %v1390_v54 = vmul.f32 1.442695, %v1282_v51  ;;  %v1220_v55 = vmax.f32 %v1156_v14, 0.0  ;;  %v1094_v57 = vmul.f32 2.0, %v731_v58  ;;  %v733_v13 = vpop.f32.mrb[17].mxu1  ;;  %v1034_v34 = vadd.f32 %v2230_v21, %v2356_v30 }
 0x1d1   : > { %v1881_v62 = vpop.eup %1880  ;;  %v1449_v0 = vadd.f32 %v1879_v41, %v1448_v46  ;;  %v1392_v2 = vmul.f32 1.442695, %v1283_v53  ;;  %v1221_v3 = vmax.f32 %v1157_v59, 0.0  ;;  %v1095_v4 = vmul.f32 2.0, %v733_v13  ;;  %v959_v59 = vpop.permute.xlu1 %958 }
 0x1d2   : > { %v1486_v5 = vadd.f32 %v1881_v62, %v1485_v50  ;;  %1890 = vpow2.f32 %v1390_v54  ;;  %v1284_v6 = vsub.f32 0.0, %v1220_v55  ;;  %v1158_v22 = vsub.f32 %v1030_v52, %v1094_v57 }
 0x1d3   : > { %1892 = vpow2.f32 %v1392_v2  ;;  %v1285_v63 = vsub.f32 0.0, %v1221_v3  ;;  %v1159_v32 = vsub.f32 %v1031_v12, %v1095_v4  ;;  %v737_v7 = vpop.f32.mrb[18].mxu1  ;;  %v1035_v38 = vadd.f32 %v2234_v23, %v2356_v30 }
 0x1d4   : > { %v1883_v1 = vpop.eup %1882  ;;  %v1394_v36 = vmul.f32 1.442695, %v1284_v6  ;;  %v1222_v9 = vmax.f32 %v1158_v22, 0.0  ;;  %v1096_v15 = vmul.f32 2.0, %v737_v7  ;;  %v739_v18 = vpop.f32.mrb[19].mxu1  ;;  %v1036_v50 = vadd.f32 %v2230_v21, %v949_v27 }
 0x1d5   : > { %v1885_v10 = vpop.eup %1884  ;;  %v1450_v19 = vadd.f32 %v1883_v1, %v1449_v0  ;;  %v1396_v20 = vmul.f32 1.442695, %v1285_v63  ;;  %v1223_v24 = vmax.f32 %v1159_v32, 0.0  ;;  %v1097_v25 = vmul.f32 2.0, %v739_v18 }
 0x1d6   : > { %v1487_v28 = vadd.f32 %v1885_v10, %v1486_v5  ;;  %1894 = vpow2.f32 %v1394_v36  ;;  %v1286_v29 = vsub.f32 0.0, %v1222_v9  ;;  %v1160_v31 = vsub.f32 %v1032_v35, %v1096_v15 }
 0x1d7   : > { %1896 = vpow2.f32 %v1396_v20  ;;  %v1287_v37 = vsub.f32 0.0, %v1223_v24  ;;  %v1161_v56 = vsub.f32 %v1033_v8, %v1097_v25  ;;  %v743_v60 = vpop.f32.mrb[20].mxu1  ;;  %v1037_v53 = vadd.f32 %v2234_v23, %v949_v27 }
 0x1d8   : > { %v1887_v33 = vpop.eup %1886  ;;  %v1398_v61 = vmul.f32 1.442695, %v1286_v29  ;;  %v1224_v39 = vmax.f32 %v1160_v31, 0.0  ;;  %v1098_v40 = vmul.f32 2.0, %v743_v60  ;;  %v745_v42 = vpop.f32.mrb[21].mxu1  ;;  %v1038_v5 = vadd.f32 %v2230_v21, %v954_v26 }
 0x1d9   : > { %v1889_v11 = vpop.eup %1888  ;;  %v1451_v43 = vadd.f32 %v1887_v33, %v1450_v19  ;;  %v1400_v44 = vmul.f32 1.442695, %v1287_v37  ;;  %v1225_v45 = vmax.f32 %v1161_v56, 0.0  ;;  %v1099_v46 = vmul.f32 2.0, %v745_v42  ;;  %v964_v19 = vpop.permute.xlu1 %963 }
 0x1da   : > { %v1488_v47 = vadd.f32 %v1889_v11, %v1487_v28  ;;  %1898 = vpow2.f32 %v1398_v61  ;;  %v1288_v48 = vsub.f32 0.0, %v1224_v39  ;;  %v1162_v49 = vsub.f32 %v1034_v34, %v1098_v40 }
 0x1db   : > { %1900 = vpow2.f32 %v1400_v44  ;;  %v1289_v51 = vsub.f32 0.0, %v1225_v45  ;;  %v1163_v14 = vsub.f32 %v1035_v38, %v1099_v46  ;;  %v749_v52 = vpop.f32.mrb[22].mxu1  ;;  %v1039_v63 = vadd.f32 %v2234_v23, %v954_v26 }
 0x1dc   : > { %v1891_v30 = vpop.eup %1890  ;;  %v1402_v58 = vmul.f32 1.442695, %v1288_v48  ;;  %v1226_v41 = vmax.f32 %v1162_v49, 0.0  ;;  %v1100_v12 = vmul.f32 2.0, %v749_v52  ;;  %v751_v54 = vpop.f32.mrb[23].mxu1  ;;  %v1040_v28 = vadd.f32 %v2230_v21, %v959_v59 }
 0x1dd   : > { %v1893_v55 = vpop.eup %1892  ;;  %v1452_v57 = vadd.f32 %v1891_v30, %v1451_v43  ;;  %v1404_v13 = vmul.f32 1.442695, %v1289_v51  ;;  %v1227_v62 = vmax.f32 %v1163_v14, 0.0  ;;  %v1101_v0 = vmul.f32 2.0, %v751_v54  ;;  %v969_v14 = vpop.permute.xlu1 %968 }
 0x1de   : > { %v1489_v2 = vadd.f32 %v1893_v55, %v1488_v47  ;;  %1902 = vpow2.f32 %v1402_v58  ;;  %v1290_v3 = vsub.f32 0.0, %v1226_v41  ;;  %v1164_v4 = vsub.f32 %v1036_v50, %v1100_v12 }
 0x1df   : > { %1904 = vpow2.f32 %v1404_v13  ;;  %v1291_v6 = vsub.f32 0.0, %v1227_v62  ;;  %v1165_v22 = vsub.f32 %v1037_v53, %v1101_v0  ;;  %v755_v27 = vpop.f32.mrb[24].mxu1  ;;  %v1041_v37 = vadd.f32 %v2234_v23, %v959_v59 }
 0x1e0   : > { %v1895_v35 = vpop.eup %1894  ;;  %v1406_v32 = vmul.f32 1.442695, %v1290_v3  ;;  %v1228_v7 = vmax.f32 %v1164_v4, 0.0  ;;  %v1102_v1 = vmul.f32 2.0, %v755_v27  ;;  %v757_v8 = vpop.f32.mrb[25].mxu1  ;;  %v1042_v46 = vadd.f32 %v2230_v21, %v964_v19 }
 0x1e1   : > { %v1897_v36 = vpop.eup %1896  ;;  %v1453_v9 = vadd.f32 %v1895_v35, %v1452_v57  ;;  %v1408_v15 = vmul.f32 1.442695, %v1291_v6  ;;  %v1229_v18 = vmax.f32 %v1165_v22, 0.0  ;;  %v1103_v10 = vmul.f32 2.0, %v757_v8 }
 0x1e2   : > { %v1490_v20 = vadd.f32 %v1897_v36, %v1489_v2  ;;  %1906 = vpow2.f32 %v1406_v32  ;;  %v1292_v24 = vsub.f32 0.0, %v1228_v7  ;;  %v1166_v25 = vsub.f32 %v1038_v5, %v1102_v1 }
 0x1e3   : > { %1908 = vpow2.f32 %v1408_v15  ;;  %v1293_v29 = vsub.f32 0.0, %v1229_v18  ;;  %v1167_v31 = vsub.f32 %v1039_v63, %v1103_v10  ;;  %v761_v26 = vpop.f32.mrb[26].mxu1  ;;  %v1043_v51 = vadd.f32 %v2234_v23, %v964_v19 }
 0x1e4   : > { %v1899_v34 = vpop.eup %1898  ;;  %v1410_v56 = vmul.f32 1.442695, %v1292_v24  ;;  %v1230_v60 = vmax.f32 %v1166_v25, 0.0  ;;  %v1104_v33 = vmul.f32 2.0, %v761_v26  ;;  %v763_v38 = vpop.f32.mrb[27].mxu1  ;;  %v1044_v0 = vadd.f32 %v2230_v21, %v969_v14 }
 0x1e5   : > { %v1901_v61 = vpop.eup %1900  ;;  %v1454_v39 = vadd.f32 %v1899_v34, %v1453_v9  ;;  %v1412_v40 = vmul.f32 1.442695, %v1293_v29  ;;  %v1231_v42 = vmax.f32 %v1167_v31, 0.0  ;;  %v1105_v11 = vmul.f32 2.0, %v763_v38 }
 0x1e6   : > { %v1491_v43 = vadd.f32 %v1901_v61, %v1490_v20  ;;  %1910 = vpow2.f32 %v1410_v56  ;;  %v1294_v44 = vsub.f32 0.0, %v1230_v60  ;;  %v1168_v45 = vsub.f32 %v1040_v28, %v1104_v33 }
 0x1e7   : > { %1912 = vpow2.f32 %v1412_v40  ;;  %v1295_v47 = vsub.f32 0.0, %v1231_v42  ;;  %v1169_v48 = vsub.f32 %v1041_v37, %v1105_v11  ;;  %v767_v49 = vpop.f32.mrb[28].mxu1  ;;  %v1045_v6 = vadd.f32 %v2234_v23, %v969_v14 }
 0x1e8   : > { %v1903_v50 = vpop.eup %1902  ;;  %v1414_v52 = vmul.f32 1.442695, %v1294_v44  ;;  %v1232_v30 = vmax.f32 %v1168_v45, 0.0  ;;  %v1106_v53 = vmul.f32 2.0, %v767_v49  ;;  %v769_v59 = vpop.f32.mrb[29].mxu1 }
 0x1e9   : > { %v1905_v58 = vpop.eup %1904  ;;  %v1455_v41 = vadd.f32 %v1903_v50, %v1454_v39  ;;  %v1416_v12 = vmul.f32 1.442695, %v1295_v47  ;;  %v1233_v54 = vmax.f32 %v1169_v48, 0.0  ;;  %v1107_v55 = vmul.f32 2.0, %v769_v59 }
 0x1ea   : > { %v1492_v57 = vadd.f32 %v1905_v58, %v1491_v43  ;;  %1914 = vpow2.f32 %v1414_v52  ;;  %v1296_v13 = vsub.f32 0.0, %v1232_v30  ;;  %v1170_v62 = vsub.f32 %v1042_v46, %v1106_v53 }
 0x1eb   : > { %1916 = vpow2.f32 %v1416_v12  ;;  %v1297_v2 = vsub.f32 0.0, %v1233_v54  ;;  %v1171_v3 = vsub.f32 %v1043_v51, %v1107_v55  ;;  %v773_v4 = vpop.f32.mrb[30].mxu1  ;;  %v2014_v53 = vmov 1966171168  }
 0x1ec   : > { %v1907_v5 = vpop.eup %1906  ;;  %v1418_v22 = vmul.f32 1.442695, %v1296_v13  ;;  %v1234_v27 = vmax.f32 %v1170_v62, 0.0  ;;  %v1108_v35 = vmul.f32 2.0, %v773_v4  ;;  %v775_v63 = vpop.f32.mrb[31].mxu1  ;;  %v1509_v59 = vunpack.c.l.s4 %v2014_v53 }
 0x1ed   : > { %v1909_v32 = vpop.eup %1908  ;;  %v1456_v7 = vadd.f32 %v1907_v5, %v1455_v41  ;;  %v1420_v1 = vmul.f32 1.442695, %v1297_v2  ;;  %v1235_v8 = vmax.f32 %v1171_v3, 0.0  ;;  %v1109_v36 = vmul.f32 2.0, %v775_v63  ;;  %v1430_v5 = vld [vmem:[#allocation2] sm:$0x3] }
 0x1ee   : > { %v1493_v9 = vadd.f32 %v1909_v32, %v1492_v57  ;;  %1918 = vpow2.f32 %v1418_v22  ;;  %v1298_v15 = vsub.f32 0.0, %v1234_v27  ;;  %v1172_v21 = vsub.f32 %v1044_v0, %v1108_v35 }
 0x1ef   : > { %1920 = vpow2.f32 %v1420_v1  ;;  %v1299_v18 = vsub.f32 0.0, %v1235_v8  ;;  %v1173_v10 = vsub.f32 %v1045_v6, %v1109_v36  ;;  %v1510_v55 = vunpack.c.0.s8 %v1509_v59 }
 0x1f0   : > { %v1911_v19 = vpop.eup %1910  ;;  %v1422_v20 = vmul.f32 1.442695, %v1298_v15  ;;  %v1236_v24 = vmax.f32 %v1172_v21, 0.0 }
 0x1f1   : > { %v1913_v23 = vpop.eup %1912  ;;  %v1457_v25 = vadd.f32 %v1911_v19, %v1456_v7  ;;  %v1424_v28 = vmul.f32 1.442695, %v1299_v18  ;;  %v1237_v29 = vmax.f32 %v1173_v10, 0.0  ;;  %v1513_v2 = vsub.s32 %v1510_v55, %v2221_v16 }
 0x1f2   : > { %v1494_v31 = vadd.f32 %v1913_v23, %v1493_v9  ;;  %1922 = vpow2.f32 %v1422_v20  ;;  %v1300_v26 = vsub.f32 0.0, %v1236_v24 }
 0x1f3   : > { %1924 = vpow2.f32 %v1424_v28  ;;  %v1301_v34 = vsub.f32 0.0, %v1237_v29 }
 0x1f4   : > { %v1915_v37 = vpop.eup %1914  ;;  %v1426_v56 = vmul.f32 1.442695, %v1300_v26 }
 0x1f5   : > { %v1917_v60 = vpop.eup %1916  ;;  %v1458_v33 = vadd.f32 %v1915_v37, %v1457_v25  ;;  %v1428_v38 = vmul.f32 1.442695, %v1301_v34 }
 0x1f6   : > { %v1495_v61 = vadd.f32 %v1917_v60, %v1494_v31  ;;  %1926 = vpow2.f32 %v1426_v56 }
 0x1f7   : > { %1928 = vpow2.f32 %v1428_v38 }
 0x1f8   : > { %v1919_v39 = vpop.eup %1918 }
 0x1f9   : > { %v1921_v40 = vpop.eup %1920  ;;  %v1459_v42 = vadd.f32 %v1919_v39, %v1458_v33 }
 0x1fa   : > { %v1496_v11 = vadd.f32 %v1921_v40, %v1495_v61 }
 0x1fc   : > { %v1923_v43 = vpop.eup %1922 }
 0x1fd   : > { %v1925_v44 = vpop.eup %1924  ;;  %v1460_v45 = vadd.f32 %v1923_v43, %v1459_v42 }
 0x1fe   : > { %v1497_v46 = vadd.f32 %v1925_v44, %v1496_v11 }
 0x200   : > { %v1927_v47 = vpop.eup %1926 }
 0x201   : > { %v1929_v48 = vpop.eup %1928  ;;  %v1461_v49 = vadd.f32 %v1927_v47, %v1460_v45 }
 0x202   : > { %v1498_v50 = vadd.f32 %v1929_v48, %v1497_v46 }
 0x203   : > { %v1462_v51 = vrot.slane %v1461_v49, 4 }
 0x204   : > { %v1499_v14 = vrot.slane %v1498_v50, 4 }
 0x205   : > { %v1463_v52 = vadd.f32 %v1462_v51, %v1461_v49 }
 0x206   : > { %v1500_v30 = vadd.f32 %v1499_v14, %v1498_v50 }
 0x207   : > { %v1464_v58 = vrot.slane %v1463_v52, 2 }
 0x208   : > { %v1501_v41 = vrot.slane %v1500_v30, 2 }
 0x209   : > { %v1465_v12 = vadd.f32 %v1464_v58, %v1463_v52 }
 0x20a   : > { %v1502_v54 = vadd.f32 %v1501_v41, %v1500_v30 }
 0x20b   : > { %v1466_v57 = vrot.slane %v1465_v12, 1 }
 0x20c   : > { %v1503_v13 = vrot.slane %v1502_v54, 1 }
 0x20d   : > { %v1467_v62 = vadd.f32 %v1466_v57, %v1465_v12 }
 0x20e   : > { %v1504_v0 = vadd.f32 %v1503_v13, %v1502_v54 }
 0x210   : > { %v1507_v3 = vcombine.low %v1467_v62, %v1504_v0 }
 0x212   : > { %v1514_v4 = vrot.slane %v1507_v3, %v1513_v2 }
 0x214   : > { %v1521_v6 = vrot.slane %v1514_v4, %v1513_v2 }
 0x216   : > { %v1523_v22 = vadd.f32 %v1521_v6, %v1430_v5 }
 0x218   : > { %1528 = vst.msk [vmem:[#allocation2] sm:$0x3] %vm2277_vm2, %v1523_v22 }
 0x21f   : > { %v1532_v27 = vld [vmem:[#allocation2] sm:$0x3] }
 0x220   : > { %1930 = vrsqrt.f32 %v1532_v27 }
 0x22a   : > { %v1931_v16 = vpop.eup %1930 }
 0x22b   : > { %1534 = vst.msk [vmem:[%s298_s6] sm:$0x3] %vm2277_vm2, %v1931_v16 }
 0x22c   : > { %1945 = shalt.err (!%p1942_p5)
}
 0x22d   : > { %s1946_s21 = scalar_lea.hbm %s2392_s10, 32  ;;  %s1950_s26 = scalar_lea.hbm %s2445_s4, 64 }
 0x22e   : > { %p1947_p6 = scmp.ne.s32.totalorder %s2392_s10, %s1946_s21  ;;  %p1951_p10 = scmp.lt.u32.totalorder %s2392_s10, %s2445_s4 }
 0x22f   : > { %p1952_p11 = scmp.lt.u32.totalorder %s1950_s26, %s1946_s21  ;;  %p1954_p13 = scmp.lt.u32.totalorder %s1946_s21, %s2392_s10 }
 0x230   : > { %p1948_p7 = pnand %p1947_p6, %p2081_p4 }
 0x231   : > { %p1953_p12 = por %p1952_p11, %p1951_p10 }
 0x232   : > { %p1949_p9 = pneg %p1948_p7 }
 0x233   : > { %p1955_p0 = por %p1954_p13, %p1953_p12 }
 0x235   : > { %p1956_p1 = pnand %p1955_p0, %p1949_p9 }
 0x237   : > { %1959 = shalt.err (!%p1956_p1)
}
 0x238   : > { %1740 = dma.vmem_to_hbm [thread:$0]  (%p2081_p4), %s2394_s7, 32, %s2392_s10, %s1536_s11  }
 0x239 PF: > { %p1746_p2 = scmp.ge.s32.totalorder %s2010_s20, 2  ;;  %s1564_s5 = sand.u32 1, %s1990_s15  }
 0x23a   : > { %s1565_s6 = scalar_lea.sflag [#allocation4], %s1564_s5 }
 0x23b   : > { %p1743_p3 = pnand %p1746_p2, %p2088_p8 }
 0x23d   : > { %1985 = dma.done.wait (!%p1743_p3), %s1565_s6, 32  }
 0x23e   : > { %1987 = vsyncadd (!%p1743_p3), %s1565_s6, 4294967264  ;;  %s17_s20 = sadd.s32 1, %s2010_s20   ;;  %s2450_s15 = smov %s1994_s16 }
 0x23f   : > { %p14_p5 = scmp.ge.s32.totalorder %s17_s20, 4   ;;  %s2451_s16 = smov %s1998_s17 }
 0x240   : > { %s2452_s17 = smov %s2094_s28  ;;  %s2453_s18 = smov %s2006_s19 }
 0x241   : > { %s2454_s19 = smov %s2456_s23  ;;  %16 = sbr.rel (!%p14_p5) target bundleno = 4 (0x4), region = 88 }
 0x248   :  { %1570 = vsyncpa [#allocation4], 1 }
 0x249   :  { %1572 = vsyncpa [#allocation4 + $0x1], 1 }

</bundles_post_ra>
